<compile_context>
chip_gen: v7x
topology: tpu7x:2x2x1
jax: 0.10.0
libtpu: 0.0.40
codegen_flags: <defaults>
</compile_context>

<pallas_src>
import jax
import jax.numpy as jnp
from jax.experimental import pallas as pl
from jax.experimental.pallas import tpu as pltpu

# ---------------- config (small, consistent with the module) ----------------
VOCAB = 50          # len(config.tokenizer.vocab)
EMB = 16            # config.emb_size
D_MODEL = 32        # config.d_model
N_HEADS = 4
D_HEAD = D_MODEL // N_HEADS
D_FF = 64
N_LAYERS = 2
N_LABELS = 9        # len(config.label2id)
OUT_PAD = 128       # lane-dense padded out_fc width
BATCH = 2
SEQ = 8
BS = BATCH * SEQ
LN_EPS = 1e-5
NEG_INF = -1e9


# ---------------------------- fused Pallas kernel ----------------------------
def _layer_norm(x, g, b):
    mu = jnp.mean(x, axis=-1, keepdims=True)
    xc = x - mu
    var = jnp.mean(xc * xc, axis=-1, keepdims=True)
    return xc * jax.lax.rsqrt(var + LN_EPS) * g + b


def _tener_fused_kernel(
    ids_ref, mask_ref, segr_ref, segc_ref,
    tab_ref, in_b_ref,
    wqk_ref, bqk_ref, wvo_ref, bvo_ref, bo_ref,
    w1_ref, b1_ref, w2_ref, b2_ref,
    ln1g_ref, ln1b_ref, ln2g_ref, ln2b_ref,
    out_w_ref, out_b_ref,
    o_ref,
):
    bf16 = jnp.bfloat16

    # ---- fused embedding + in_fc: ONE one-hot gather-matmul against the
    #      precomputed [VOCAB, D_MODEL] table (= emb @ in_fc_w); bias after ----
    ids = ids_ref[...]                                                # [BS,1] i32
    onehot = (jax.lax.broadcasted_iota(jnp.int32, (BS, VOCAB), 1) == ids)
    onehot = onehot.astype(jnp.float32).astype(bf16)                  # [BS,V]
    x = jnp.dot(onehot, tab_ref[...],
                preferred_element_type=jnp.float32) + in_b_ref[...]   # [BS,D] f32

    # ---- additive attention bias, hoisted & materialized ONCE ----
    # 0 where the key is a valid (non-pad) token of the SAME sequence as the
    # query, -1e9 otherwise.  Working on the flat BS axis keeps every
    # attention matmul a plain 2-D dot (no [B,S,H,Dh] reshapes / transposes
    # inside the layer loop).
    same_seq = segr_ref[...] == segc_ref[...]                         # [BS,BS]
    key_ok = mask_ref[...] > 0.5                                      # [1,BS]
    attn_bias = jnp.where(same_seq & key_ok,
                          jnp.float32(0.0), jnp.float32(NEG_INF))     # [BS,BS]

    for l in range(N_LAYERS):                    # static unroll (2 layers)
        xb = x.astype(bf16)

        # fused Q|K projection (1/sqrt(Dh) pre-folded into the Q columns) and
        # fused per-head value+output projection (Wvo_h = Wv_h @ Wo_h),
        # lane-dense [BS, H*D] = [16, 128] result.
        qk = jnp.dot(xb, wqk_ref[l],
                     preferred_element_type=jnp.float32) + bqk_ref[l]  # [BS,2D]
        vo = jnp.dot(xb, wvo_ref[l],
                     preferred_element_type=jnp.float32) + bvo_ref[l]  # [BS,H*D]
        q = qk[:, :D_MODEL].astype(bf16)
        k = qk[:, D_MODEL:].astype(bf16)
        vob = vo.astype(bf16)

        attn = jnp.zeros((BS, D_MODEL), jnp.float32)
        for h in range(N_HEADS):                 # static unroll (4 heads)
            hs = slice(h * D_HEAD, (h + 1) * D_HEAD)
            s = jnp.einsum("qd,kd->qk", q[:, hs], k[:, hs],
                           preferred_element_type=jnp.float32)         # [BS,BS]
            s = s + attn_bias
            s = s - jnp.max(s, axis=-1, keepdims=True)
            p = jnp.exp(s)
            p = p * pl.reciprocal(jnp.sum(p, axis=-1, keepdims=True),
                                  approx=True)                         # EUP vrcp
            # head output already carries Wo_h (folded at init): [BS, D]
            attn = attn + jnp.dot(p.astype(bf16),
                                  vob[:, h * D_MODEL:(h + 1) * D_MODEL],
                                  preferred_element_type=jnp.float32)
        a = attn + bo_ref[l]

        # residual + post-LN, ReLU FFN + residual + post-LN (elementwise f32)
        x = _layer_norm(x + a, ln1g_ref[l], ln1b_ref[l])
        hdn = jnp.dot(x.astype(bf16), w1_ref[l],
                      preferred_element_type=jnp.float32) + b1_ref[l]
        hdn = jnp.maximum(hdn, 0.0)
        hdn = jnp.dot(hdn.astype(bf16), w2_ref[l],
                      preferred_element_type=jnp.float32) + b2_ref[l]
        x = _layer_norm(x + hdn, ln2g_ref[l], ln2b_ref[l])

    # fc_dropout = identity at inference.  out_fc is zero-padded to 128 output
    # lanes so this store is lane-dense; wrapper slices [:, :N_LABELS].
    o_ref[...] = jnp.dot(x.astype(bf16), out_w_ref[...],
                         preferred_element_type=jnp.float32) + out_b_ref[...]


# ------------------------------ wrapper --------------------------------------
def tener_forward(kparams, input_ids, input_mask):
    B, S = input_ids.shape
    bs = B * S
    ids = input_ids.reshape(bs, 1).astype(jnp.int32)
    mask_flat = input_mask.reshape(1, bs).astype(jnp.float32)
    seg = jnp.repeat(jnp.arange(B, dtype=jnp.int32), S)   # sequence id per token
    seg_row = seg.reshape(bs, 1)
    seg_col = seg.reshape(1, bs)

    inputs = (
        ids, mask_flat, seg_row, seg_col,
        kparams["tab"], kparams["in_fc_b"],
        kparams["wqk"], kparams["bqk"], kparams["wvo"], kparams["bvo"],
        kparams["bo"],
        kparams["w1"], kparams["b1"], kparams["w2"], kparams["b2"],
        kparams["ln1_g"], kparams["ln1_b"], kparams["ln2_g"], kparams["ln2_b"],
        kparams["out_w"], kparams["out_b"],
    )
    vmem = pl.BlockSpec(memory_space=pltpu.MemorySpace.VMEM)
    logits_pad = pl.pallas_call(
        _tener_fused_kernel,
        out_shape=jax.ShapeDtypeStruct((bs, OUT_PAD), jnp.float32),
        in_specs=[vmem] * len(inputs),       # grid-free: full arrays in VMEM
        out_specs=vmem,
    )(*inputs)
    return logits_pad[:, :N_LABELS].reshape(B, S, N_LABELS)


# ------------------------------ params ---------------------------------------
def init_params(key):
    def nrm(k, shape):
        # nn.Linear / nn.Embedding weights ~ N(0, 0.02); biases zero.
        return (0.02 * jax.random.normal(k, shape)).astype(jnp.float32)

    keys = jax.random.split(key, 7)
    z = lambda *s: jnp.zeros(s, jnp.float32)
    one = lambda *s: jnp.ones(s, jnp.float32)
    return {
        "emb": nrm(keys[0], (VOCAB, EMB)),
        "in_fc_w": nrm(keys[1], (EMB, D_MODEL)), "in_fc_b": z(1, D_MODEL),
        "out_fc_w": nrm(keys[2], (D_MODEL, N_LABELS)), "out_fc_b": z(1, N_LABELS),
        "wqkv": nrm(keys[3], (N_LAYERS, D_MODEL, 3 * D_MODEL)),
        "bqkv": z(N_LAYERS, 1, 3 * D_MODEL),
        "wo": nrm(keys[4], (N_LAYERS, D_MODEL, D_MODEL)),
        "bo": z(N_LAYERS, 1, D_MODEL),
        "w1": nrm(keys[5], (N_LAYERS, D_MODEL, D_FF)), "b1": z(N_LAYERS, 1, D_FF),
        "w2": nrm(keys[6], (N_LAYERS, D_FF, D_MODEL)), "b2": z(N_LAYERS, 1, D_MODEL),
        "ln1_g": one(N_LAYERS, 1, D_MODEL), "ln1_b": z(N_LAYERS, 1, D_MODEL),
        "ln2_g": one(N_LAYERS, 1, D_MODEL), "ln2_b": z(N_LAYERS, 1, D_MODEL),
    }


def prepare_kernel_params(raw):
    """One-time algebraic folds -> kernel-ready, MXU/lane-friendly params."""
    bf16, f32 = jnp.bfloat16, jnp.float32
    scale = jnp.float32(1.0 / (D_HEAD ** 0.5))

    # (1) fuse embedding + in_fc into a single [VOCAB, D_MODEL] table.
    tab = (raw["emb"] @ raw["in_fc_w"]).astype(bf16)

    wq = raw["wqkv"][:, :, 0 * D_MODEL:1 * D_MODEL] * scale   # fold 1/sqrt(Dh)
    wk = raw["wqkv"][:, :, 1 * D_MODEL:2 * D_MODEL]
    wv = raw["wqkv"][:, :, 2 * D_MODEL:3 * D_MODEL]
    bq = raw["bqkv"][:, :, 0 * D_MODEL:1 * D_MODEL] * scale
    bk = raw["bqkv"][:, :, 1 * D_MODEL:2 * D_MODEL]
    bv = raw["bqkv"][:, :, 2 * D_MODEL:3 * D_MODEL]
    wo, bo = raw["wo"], raw["bo"]

    # (2) fold per-head value projection with the output projection:
    #     (P_h @ (x Wv_h + bv_h)) Wo_h == P_h @ (x (Wv_h Wo_h) + bv_h Wo_h)
    wvo = jnp.stack([
        jnp.concatenate([wv[l, :, h * D_HEAD:(h + 1) * D_HEAD]
                         @ wo[l, h * D_HEAD:(h + 1) * D_HEAD, :]
                         for h in range(N_HEADS)], axis=-1)
        for l in range(N_LAYERS)])                              # [L, D, H*D]
    bvo = jnp.stack([
        jnp.concatenate([bv[l, :, h * D_HEAD:(h + 1) * D_HEAD]
                         @ wo[l, h * D_HEAD:(h + 1) * D_HEAD, :]
                         for h in range(N_HEADS)], axis=-1)
        for l in range(N_LAYERS)])                              # [L, 1, H*D]

    # (3) lane-dense, zero-padded out_fc (9 -> 128 columns).
    out_w = jnp.zeros((D_MODEL, OUT_PAD), f32).at[:, :N_LABELS].set(raw["out_fc_w"])
    out_b = jnp.zeros((1, OUT_PAD), f32).at[:, :N_LABELS].set(raw["out_fc_b"])

    return {
        "tab": tab, "in_fc_b": raw["in_fc_b"],
        "wqk": jnp.concatenate([wq, wk], axis=-1).astype(bf16),  # [L, D, 2D]
        "bqk": jnp.concatenate([bq, bk], axis=-1),               # [L, 1, 2D] f32
        "wvo": wvo.astype(bf16), "bvo": bvo, "bo": bo,
        "w1": raw["w1"].astype(bf16), "b1": raw["b1"],
        "w2": raw["w2"].astype(bf16), "b2": raw["b2"],
        "ln1_g": raw["ln1_g"], "ln1_b": raw["ln1_b"],
        "ln2_g": raw["ln2_g"], "ln2_b": raw["ln2_b"],
        "out_w": out_w.astype(bf16), "out_b": out_b,
    }


# ------------------------------ main ------------------------------------------
if __name__ == "__main__":
    key = jax.random.PRNGKey(0)
    pkey, ikey = jax.random.split(key)
    raw_params = init_params(pkey)
    kparams = prepare_kernel_params(raw_params)

    input_ids = jax.random.randint(ikey, (BATCH, SEQ), 0, VOCAB, dtype=jnp.int32)
    lens = jnp.array([SEQ, SEQ - 3], dtype=jnp.int32)
    input_mask = (jnp.arange(SEQ)[None, :] < lens[:, None]).astype(jnp.int32)

    logits = jax.jit(tener_forward)(kparams, input_ids, input_mask)
    jax.block_until_ready(logits)
    assert logits.shape == (BATCH, SEQ, N_LABELS)
    print("KERNEL_OK")
</pallas_src>

<mosaic_0001>
module attributes {stable_mosaic.version = 11 : i64} {
  func.func @_tener_fused_kernel(%arg0: memref<16x1xi32, #tpu.memory_space<vmem>>, %arg1: memref<1x16xf32, #tpu.memory_space<vmem>>, %arg2: memref<16x1xi32, #tpu.memory_space<vmem>>, %arg3: memref<1x16xi32, #tpu.memory_space<vmem>>, %arg4: memref<50x32xbf16, #tpu.memory_space<vmem>>, %arg5: memref<1x32xf32, #tpu.memory_space<vmem>>, %arg6: memref<2x32x64xbf16, #tpu.memory_space<vmem>>, %arg7: memref<2x1x64xf32, #tpu.memory_space<vmem>>, %arg8: memref<2x32x128xbf16, #tpu.memory_space<vmem>>, %arg9: memref<2x1x128xf32, #tpu.memory_space<vmem>>, %arg10: memref<2x1x32xf32, #tpu.memory_space<vmem>>, %arg11: memref<2x32x64xbf16, #tpu.memory_space<vmem>>, %arg12: memref<2x1x64xf32, #tpu.memory_space<vmem>>, %arg13: memref<2x64x32xbf16, #tpu.memory_space<vmem>>, %arg14: memref<2x1x32xf32, #tpu.memory_space<vmem>>, %arg15: memref<2x1x32xf32, #tpu.memory_space<vmem>>, %arg16: memref<2x1x32xf32, #tpu.memory_space<vmem>>, %arg17: memref<2x1x32xf32, #tpu.memory_space<vmem>>, %arg18: memref<2x1x32xf32, #tpu.memory_space<vmem>>, %arg19: memref<32x128xbf16, #tpu.memory_space<vmem>>, %arg20: memref<1x128xf32, #tpu.memory_space<vmem>>, %arg21: memref<16x128xf32, #tpu.memory_space<vmem>>) attributes {dimension_semantics = [], scalar_prefetch = 0 : i64, scratch_operands = 0 : i64, tpu.core_type = #tpu.core_type<tc>} {
    %c0 = arith.constant 0 : index
    %c0_0 = arith.constant 0 : index
    %0 = vector.load %arg0[%c0, %c0_0] : memref<16x1xi32, #tpu.memory_space<vmem>>, vector<16x1xi32>
    %1 = tpu.iota {dimensions = array<i32: 1>} : vector<16x50xi32>
    %2 = vector.broadcast %0 : vector<16x1xi32> to vector<16x50xi32>
    %3 = arith.cmpi eq, %1, %2 : vector<16x50xi32>
    %4 = arith.extui %3 : vector<16x50xi1> to vector<16x50xi32>
    %5 = arith.sitofp %4 : vector<16x50xi32> to vector<16x50xf32>
    %6 = arith.truncf %5 : vector<16x50xf32> to vector<16x50xbf16>
    %c0_1 = arith.constant 0 : index
    %c0_2 = arith.constant 0 : index
    %7 = vector.load %arg4[%c0_1, %c0_2] : memref<50x32xbf16, #tpu.memory_space<vmem>>, vector<50x32xbf16>
    %cst = arith.constant dense<0.000000e+00> : vector<16x32xf32>
    %8 = tpu.matmul %6, %7, %cst {dimension_numbers = #tpu.dot_dimension_numbers<[1], [0], [0], [1], [0, 0, 1, 1], [], []>} : vector<16x50xbf16>, vector<50x32xbf16>, vector<16x32xf32> -> vector<16x32xf32>
    %c0_3 = arith.constant 0 : index
    %c0_4 = arith.constant 0 : index
    %9 = vector.load %arg5[%c0_3, %c0_4] : memref<1x32xf32, #tpu.memory_space<vmem>>, vector<1x32xf32>
    %10 = vector.broadcast %9 : vector<1x32xf32> to vector<16x32xf32>
    %11 = arith.addf %8, %10 : vector<16x32xf32>
    %c0_5 = arith.constant 0 : index
    %c0_6 = arith.constant 0 : index
    %12 = vector.load %arg2[%c0_5, %c0_6] : memref<16x1xi32, #tpu.memory_space<vmem>>, vector<16x1xi32>
    %c0_7 = arith.constant 0 : index
    %c0_8 = arith.constant 0 : index
    %13 = vector.load %arg3[%c0_7, %c0_8] : memref<1x16xi32, #tpu.memory_space<vmem>>, vector<1x16xi32>
    %14 = vector.broadcast %12 : vector<16x1xi32> to vector<16x16xi32>
    %15 = vector.broadcast %13 : vector<1x16xi32> to vector<16x16xi32>
    %16 = arith.cmpi eq, %14, %15 : vector<16x16xi32>
    %c0_9 = arith.constant 0 : index
    %c0_10 = arith.constant 0 : index
    %17 = vector.load %arg1[%c0_9, %c0_10] : memref<1x16xf32, #tpu.memory_space<vmem>>, vector<1x16xf32>
    %cst_11 = arith.constant 5.000000e-01 : f32
    %18 = vector.broadcast %cst_11 : f32 to vector<1x16xf32>
    %19 = arith.cmpf ogt, %17, %18 : vector<1x16xf32>
    %20 = vector.broadcast %19 : vector<1x16xi1> to vector<16x16xi1>
    %21 = arith.andi %16, %20 : vector<16x16xi1>
    %cst_12 = arith.constant 0.000000e+00 : f32
    %cst_13 = arith.constant -1.000000e+09 : f32
    %22 = vector.broadcast %cst_12 : f32 to vector<16x16xf32>
    %23 = vector.broadcast %cst_13 : f32 to vector<16x16xf32>
    %24 = arith.select %21, %22, %23 : vector<16x16xi1>, vector<16x16xf32>
    %25 = arith.truncf %11 : vector<16x32xf32> to vector<16x32xbf16>
    %c0_14 = arith.constant 0 : index
    %c0_15 = arith.constant 0 : index
    %c0_16 = arith.constant 0 : index
    %26 = vector.load %arg6[%c0_14, %c0_15, %c0_16] : memref<2x32x64xbf16, #tpu.memory_space<vmem>>, vector<1x32x64xbf16>
    %27 = vector.shape_cast %26 : vector<1x32x64xbf16> to vector<32x64xbf16>
    %cst_17 = arith.constant dense<0.000000e+00> : vector<16x64xf32>
    %28 = tpu.matmul %25, %27, %cst_17 {dimension_numbers = #tpu.dot_dimension_numbers<[1], [0], [0], [1], [0, 0, 1, 1], [], []>} : vector<16x32xbf16>, vector<32x64xbf16>, vector<16x64xf32> -> vector<16x64xf32>
    %c0_18 = arith.constant 0 : index
    %c0_19 = arith.constant 0 : index
    %c0_20 = arith.constant 0 : index
    %29 = vector.load %arg7[%c0_18, %c0_19, %c0_20] : memref<2x1x64xf32, #tpu.memory_space<vmem>>, vector<1x1x64xf32>
    %30 = vector.shape_cast %29 : vector<1x1x64xf32> to vector<1x64xf32>
    %31 = vector.broadcast %30 : vector<1x64xf32> to vector<16x64xf32>
    %32 = arith.addf %28, %31 : vector<16x64xf32>
    %c0_21 = arith.constant 0 : index
    %c0_22 = arith.constant 0 : index
    %c0_23 = arith.constant 0 : index
    %33 = vector.load %arg8[%c0_21, %c0_22, %c0_23] : memref<2x32x128xbf16, #tpu.memory_space<vmem>>, vector<1x32x128xbf16>
    %34 = vector.shape_cast %33 : vector<1x32x128xbf16> to vector<32x128xbf16>
    %cst_24 = arith.constant dense<0.000000e+00> : vector<16x128xf32>
    %35 = tpu.matmul %25, %34, %cst_24 {dimension_numbers = #tpu.dot_dimension_numbers<[1], [0], [0], [1], [0, 0, 1, 1], [], []>} : vector<16x32xbf16>, vector<32x128xbf16>, vector<16x128xf32> -> vector<16x128xf32>
    %c0_25 = arith.constant 0 : index
    %c0_26 = arith.constant 0 : index
    %c0_27 = arith.constant 0 : index
    %36 = vector.load %arg9[%c0_25, %c0_26, %c0_27] : memref<2x1x128xf32, #tpu.memory_space<vmem>>, vector<1x1x128xf32>
    %37 = vector.shape_cast %36 : vector<1x1x128xf32> to vector<1x128xf32>
    %38 = vector.broadcast %37 : vector<1x128xf32> to vector<16x128xf32>
    %39 = arith.addf %35, %38 : vector<16x128xf32>
    %40 = vector.extract_strided_slice %32 {offsets = [0, 0], sizes = [16, 32], strides = [1, 1]} : vector<16x64xf32> to vector<16x32xf32>
    %41 = arith.truncf %40 : vector<16x32xf32> to vector<16x32xbf16>
    %42 = vector.extract_strided_slice %32 {offsets = [0, 32], sizes = [16, 32], strides = [1, 1]} : vector<16x64xf32> to vector<16x32xf32>
    %43 = arith.truncf %42 : vector<16x32xf32> to vector<16x32xbf16>
    %44 = arith.truncf %39 : vector<16x128xf32> to vector<16x128xbf16>
    %cst_28 = arith.constant 0.000000e+00 : f32
    %45 = vector.broadcast %cst_28 : f32 to vector<16x32xf32>
    %46 = vector.extract_strided_slice %41 {offsets = [0, 0], sizes = [16, 8], strides = [1, 1]} : vector<16x32xbf16> to vector<16x8xbf16>
    %47 = vector.extract_strided_slice %43 {offsets = [0, 0], sizes = [16, 8], strides = [1, 1]} : vector<16x32xbf16> to vector<16x8xbf16>
    "tpu.trace_start"() <{level = 10 : i32, message = "qd,kd->qk"}> : () -> ()
    %cst_29 = arith.constant dense<0.000000e+00> : vector<16x16xf32>
    %48 = tpu.matmul %46, %47, %cst_29 {dimension_numbers = #tpu.dot_dimension_numbers<[1], [1], [0], [0], [0, 0, 1, 0], [], []>} : vector<16x8xbf16>, vector<16x8xbf16>, vector<16x16xf32> -> vector<16x16xf32>
    "tpu.trace_stop"() : () -> ()
    %49 = arith.addf %48, %24 : vector<16x16xf32>
    %cst_30 = arith.constant dense<0xFF800000> : vector<16xf32>
    %50 = vector.multi_reduction <maximumf>, %49, %cst_30 [1] : vector<16x16xf32> to vector<16xf32>
    %51 = vector.shape_cast %50 : vector<16xf32> to vector<16x1xf32>
    %52 = vector.broadcast %51 : vector<16x1xf32> to vector<16x16xf32>
    %53 = arith.subf %49, %52 : vector<16x16xf32>
    %54 = math.exp %53 : vector<16x16xf32>
    %cst_31 = arith.constant dense<0.000000e+00> : vector<16xf32>
    %55 = vector.multi_reduction <add>, %54, %cst_31 [1] : vector<16x16xf32> to vector<16xf32>
    %56 = vector.shape_cast %55 : vector<16xf32> to vector<16x1xf32>
    %57 = tpu.reciprocal %56 {approx = true} : vector<16x1xf32> -> vector<16x1xf32>
    %58 = vector.broadcast %57 : vector<16x1xf32> to vector<16x16xf32>
    %59 = arith.mulf %54, %58 : vector<16x16xf32>
    %60 = arith.truncf %59 : vector<16x16xf32> to vector<16x16xbf16>
    %61 = vector.extract_strided_slice %44 {offsets = [0, 0], sizes = [16, 32], strides = [1, 1]} : vector<16x128xbf16> to vector<16x32xbf16>
    %cst_32 = arith.constant dense<0.000000e+00> : vector<16x32xf32>
    %62 = tpu.matmul %60, %61, %cst_32 {dimension_numbers = #tpu.dot_dimension_numbers<[1], [0], [0], [1], [0, 0, 1, 1], [], []>} : vector<16x16xbf16>, vector<16x32xbf16>, vector<16x32xf32> -> vector<16x32xf32>
    %63 = arith.addf %45, %62 : vector<16x32xf32>
    %64 = vector.extract_strided_slice %41 {offsets = [0, 8], sizes = [16, 8], strides = [1, 1]} : vector<16x32xbf16> to vector<16x8xbf16>
    %65 = vector.extract_strided_slice %43 {offsets = [0, 8], sizes = [16, 8], strides = [1, 1]} : vector<16x32xbf16> to vector<16x8xbf16>
    "tpu.trace_start"() <{level = 10 : i32, message = "qd,kd->qk"}> : () -> ()
    %cst_33 = arith.constant dense<0.000000e+00> : vector<16x16xf32>
    %66 = tpu.matmul %64, %65, %cst_33 {dimension_numbers = #tpu.dot_dimension_numbers<[1], [1], [0], [0], [0, 0, 1, 0], [], []>} : vector<16x8xbf16>, vector<16x8xbf16>, vector<16x16xf32> -> vector<16x16xf32>
    "tpu.trace_stop"() : () -> ()
    %67 = arith.addf %66, %24 : vector<16x16xf32>
    %cst_34 = arith.constant dense<0xFF800000> : vector<16xf32>
    %68 = vector.multi_reduction <maximumf>, %67, %cst_34 [1] : vector<16x16xf32> to vector<16xf32>
    %69 = vector.shape_cast %68 : vector<16xf32> to vector<16x1xf32>
    %70 = vector.broadcast %69 : vector<16x1xf32> to vector<16x16xf32>
    %71 = arith.subf %67, %70 : vector<16x16xf32>
    %72 = math.exp %71 : vector<16x16xf32>
    %cst_35 = arith.constant dense<0.000000e+00> : vector<16xf32>
    %73 = vector.multi_reduction <add>, %72, %cst_35 [1] : vector<16x16xf32> to vector<16xf32>
    %74 = vector.shape_cast %73 : vector<16xf32> to vector<16x1xf32>
    %75 = tpu.reciprocal %74 {approx = true} : vector<16x1xf32> -> vector<16x1xf32>
    %76 = vector.broadcast %75 : vector<16x1xf32> to vector<16x16xf32>
    %77 = arith.mulf %72, %76 : vector<16x16xf32>
    %78 = arith.truncf %77 : vector<16x16xf32> to vector<16x16xbf16>
    %79 = vector.extract_strided_slice %44 {offsets = [0, 32], sizes = [16, 32], strides = [1, 1]} : vector<16x128xbf16> to vector<16x32xbf16>
    %cst_36 = arith.constant dense<0.000000e+00> : vector<16x32xf32>
    %80 = tpu.matmul %78, %79, %cst_36 {dimension_numbers = #tpu.dot_dimension_numbers<[1], [0], [0], [1], [0, 0, 1, 1], [], []>} : vector<16x16xbf16>, vector<16x32xbf16>, vector<16x32xf32> -> vector<16x32xf32>
    %81 = arith.addf %63, %80 : vector<16x32xf32>
    %82 = vector.extract_strided_slice %41 {offsets = [0, 16], sizes = [16, 8], strides = [1, 1]} : vector<16x32xbf16> to vector<16x8xbf16>
    %83 = vector.extract_strided_slice %43 {offsets = [0, 16], sizes = [16, 8], strides = [1, 1]} : vector<16x32xbf16> to vector<16x8xbf16>
    "tpu.trace_start"() <{level = 10 : i32, message = "qd,kd->qk"}> : () -> ()
    %cst_37 = arith.constant dense<0.000000e+00> : vector<16x16xf32>
    %84 = tpu.matmul %82, %83, %cst_37 {dimension_numbers = #tpu.dot_dimension_numbers<[1], [1], [0], [0], [0, 0, 1, 0], [], []>} : vector<16x8xbf16>, vector<16x8xbf16>, vector<16x16xf32> -> vector<16x16xf32>
    "tpu.trace_stop"() : () -> ()
    %85 = arith.addf %84, %24 : vector<16x16xf32>
    %cst_38 = arith.constant dense<0xFF800000> : vector<16xf32>
    %86 = vector.multi_reduction <maximumf>, %85, %cst_38 [1] : vector<16x16xf32> to vector<16xf32>
    %87 = vector.shape_cast %86 : vector<16xf32> to vector<16x1xf32>
    %88 = vector.broadcast %87 : vector<16x1xf32> to vector<16x16xf32>
    %89 = arith.subf %85, %88 : vector<16x16xf32>
    %90 = math.exp %89 : vector<16x16xf32>
    %cst_39 = arith.constant dense<0.000000e+00> : vector<16xf32>
    %91 = vector.multi_reduction <add>, %90, %cst_39 [1] : vector<16x16xf32> to vector<16xf32>
    %92 = vector.shape_cast %91 : vector<16xf32> to vector<16x1xf32>
    %93 = tpu.reciprocal %92 {approx = true} : vector<16x1xf32> -> vector<16x1xf32>
    %94 = vector.broadcast %93 : vector<16x1xf32> to vector<16x16xf32>
    %95 = arith.mulf %90, %94 : vector<16x16xf32>
    %96 = arith.truncf %95 : vector<16x16xf32> to vector<16x16xbf16>
    %97 = vector.extract_strided_slice %44 {offsets = [0, 64], sizes = [16, 32], strides = [1, 1]} : vector<16x128xbf16> to vector<16x32xbf16>
    %cst_40 = arith.constant dense<0.000000e+00> : vector<16x32xf32>
    %98 = tpu.matmul %96, %97, %cst_40 {dimension_numbers = #tpu.dot_dimension_numbers<[1], [0], [0], [1], [0, 0, 1, 1], [], []>} : vector<16x16xbf16>, vector<16x32xbf16>, vector<16x32xf32> -> vector<16x32xf32>
    %99 = arith.addf %81, %98 : vector<16x32xf32>
    %100 = vector.extract_strided_slice %41 {offsets = [0, 24], sizes = [16, 8], strides = [1, 1]} : vector<16x32xbf16> to vector<16x8xbf16>
    %101 = vector.extract_strided_slice %43 {offsets = [0, 24], sizes = [16, 8], strides = [1, 1]} : vector<16x32xbf16> to vector<16x8xbf16>
    "tpu.trace_start"() <{level = 10 : i32, message = "qd,kd->qk"}> : () -> ()
    %cst_41 = arith.constant dense<0.000000e+00> : vector<16x16xf32>
    %102 = tpu.matmul %100, %101, %cst_41 {dimension_numbers = #tpu.dot_dimension_numbers<[1], [1], [0], [0], [0, 0, 1, 0], [], []>} : vector<16x8xbf16>, vector<16x8xbf16>, vector<16x16xf32> -> vector<16x16xf32>
    "tpu.trace_stop"() : () -> ()
    %103 = arith.addf %102, %24 : vector<16x16xf32>
    %cst_42 = arith.constant dense<0xFF800000> : vector<16xf32>
    %104 = vector.multi_reduction <maximumf>, %103, %cst_42 [1] : vector<16x16xf32> to vector<16xf32>
    %105 = vector.shape_cast %104 : vector<16xf32> to vector<16x1xf32>
    %106 = vector.broadcast %105 : vector<16x1xf32> to vector<16x16xf32>
    %107 = arith.subf %103, %106 : vector<16x16xf32>
    %108 = math.exp %107 : vector<16x16xf32>
    %cst_43 = arith.constant dense<0.000000e+00> : vector<16xf32>
    %109 = vector.multi_reduction <add>, %108, %cst_43 [1] : vector<16x16xf32> to vector<16xf32>
    %110 = vector.shape_cast %109 : vector<16xf32> to vector<16x1xf32>
    %111 = tpu.reciprocal %110 {approx = true} : vector<16x1xf32> -> vector<16x1xf32>
    %112 = vector.broadcast %111 : vector<16x1xf32> to vector<16x16xf32>
    %113 = arith.mulf %108, %112 : vector<16x16xf32>
    %114 = arith.truncf %113 : vector<16x16xf32> to vector<16x16xbf16>
    %115 = vector.extract_strided_slice %44 {offsets = [0, 96], sizes = [16, 32], strides = [1, 1]} : vector<16x128xbf16> to vector<16x32xbf16>
    %cst_44 = arith.constant dense<0.000000e+00> : vector<16x32xf32>
    %116 = tpu.matmul %114, %115, %cst_44 {dimension_numbers = #tpu.dot_dimension_numbers<[1], [0], [0], [1], [0, 0, 1, 1], [], []>} : vector<16x16xbf16>, vector<16x32xbf16>, vector<16x32xf32> -> vector<16x32xf32>
    %117 = arith.addf %99, %116 : vector<16x32xf32>
    %c0_45 = arith.constant 0 : index
    %c0_46 = arith.constant 0 : index
    %c0_47 = arith.constant 0 : index
    %118 = vector.load %arg10[%c0_45, %c0_46, %c0_47] : memref<2x1x32xf32, #tpu.memory_space<vmem>>, vector<1x1x32xf32>
    %119 = vector.shape_cast %118 : vector<1x1x32xf32> to vector<1x32xf32>
    %120 = vector.broadcast %119 : vector<1x32xf32> to vector<16x32xf32>
    %121 = arith.addf %117, %120 : vector<16x32xf32>
    %122 = arith.addf %11, %121 : vector<16x32xf32>
    %c0_48 = arith.constant 0 : index
    %c0_49 = arith.constant 0 : index
    %c0_50 = arith.constant 0 : index
    %123 = vector.load %arg15[%c0_48, %c0_49, %c0_50] : memref<2x1x32xf32, #tpu.memory_space<vmem>>, vector<1x1x32xf32>
    %124 = vector.shape_cast %123 : vector<1x1x32xf32> to vector<1x32xf32>
    %c0_51 = arith.constant 0 : index
    %c0_52 = arith.constant 0 : index
    %c0_53 = arith.constant 0 : index
    %125 = vector.load %arg16[%c0_51, %c0_52, %c0_53] : memref<2x1x32xf32, #tpu.memory_space<vmem>>, vector<1x1x32xf32>
    %126 = vector.shape_cast %125 : vector<1x1x32xf32> to vector<1x32xf32>
    %cst_54 = arith.constant dense<0.000000e+00> : vector<16xf32>
    %127 = vector.multi_reduction <add>, %122, %cst_54 [1] : vector<16x32xf32> to vector<16xf32>
    %128 = vector.shape_cast %127 : vector<16xf32> to vector<16x1xf32>
    %cst_55 = arith.constant 3.200000e+01 : f32
    %129 = vector.broadcast %cst_55 : f32 to vector<16x1xf32>
    %130 = arith.divf %128, %129 : vector<16x1xf32>
    %131 = vector.broadcast %130 : vector<16x1xf32> to vector<16x32xf32>
    %132 = arith.subf %122, %131 : vector<16x32xf32>
    %133 = arith.mulf %132, %132 : vector<16x32xf32>
    %cst_56 = arith.constant dense<0.000000e+00> : vector<16xf32>
    %134 = vector.multi_reduction <add>, %133, %cst_56 [1] : vector<16x32xf32> to vector<16xf32>
    %135 = vector.shape_cast %134 : vector<16xf32> to vector<16x1xf32>
    %cst_57 = arith.constant 3.200000e+01 : f32
    %136 = vector.broadcast %cst_57 : f32 to vector<16x1xf32>
    %137 = arith.divf %135, %136 : vector<16x1xf32>
    %cst_58 = arith.constant 9.99999974E-6 : f32
    %138 = vector.broadcast %cst_58 : f32 to vector<16x1xf32>
    %139 = arith.addf %137, %138 : vector<16x1xf32>
    %140 = math.rsqrt %139 : vector<16x1xf32>
    %141 = vector.broadcast %140 : vector<16x1xf32> to vector<16x32xf32>
    %142 = arith.mulf %132, %141 : vector<16x32xf32>
    %143 = vector.broadcast %124 : vector<1x32xf32> to vector<16x32xf32>
    %144 = arith.mulf %142, %143 : vector<16x32xf32>
    %145 = vector.broadcast %126 : vector<1x32xf32> to vector<16x32xf32>
    %146 = arith.addf %144, %145 : vector<16x32xf32>
    %147 = arith.truncf %146 : vector<16x32xf32> to vector<16x32xbf16>
    %c0_59 = arith.constant 0 : index
    %c0_60 = arith.constant 0 : index
    %c0_61 = arith.constant 0 : index
    %148 = vector.load %arg11[%c0_59, %c0_60, %c0_61] : memref<2x32x64xbf16, #tpu.memory_space<vmem>>, vector<1x32x64xbf16>
    %149 = vector.shape_cast %148 : vector<1x32x64xbf16> to vector<32x64xbf16>
    %cst_62 = arith.constant dense<0.000000e+00> : vector<16x64xf32>
    %150 = tpu.matmul %147, %149, %cst_62 {dimension_numbers = #tpu.dot_dimension_numbers<[1], [0], [0], [1], [0, 0, 1, 1], [], []>} : vector<16x32xbf16>, vector<32x64xbf16>, vector<16x64xf32> -> vector<16x64xf32>
    %c0_63 = arith.constant 0 : index
    %c0_64 = arith.constant 0 : index
    %c0_65 = arith.constant 0 : index
    %151 = vector.load %arg12[%c0_63, %c0_64, %c0_65] : memref<2x1x64xf32, #tpu.memory_space<vmem>>, vector<1x1x64xf32>
    %152 = vector.shape_cast %151 : vector<1x1x64xf32> to vector<1x64xf32>
    %153 = vector.broadcast %152 : vector<1x64xf32> to vector<16x64xf32>
    %154 = arith.addf %150, %153 : vector<16x64xf32>
    %cst_66 = arith.constant 0.000000e+00 : f32
    %155 = vector.broadcast %cst_66 : f32 to vector<16x64xf32>
    %156 = arith.maximumf %154, %155 : vector<16x64xf32>
    %157 = arith.truncf %156 : vector<16x64xf32> to vector<16x64xbf16>
    %c0_67 = arith.constant 0 : index
    %c0_68 = arith.constant 0 : index
    %c0_69 = arith.constant 0 : index
    %158 = vector.load %arg13[%c0_67, %c0_68, %c0_69] : memref<2x64x32xbf16, #tpu.memory_space<vmem>>, vector<1x64x32xbf16>
    %159 = vector.shape_cast %158 : vector<1x64x32xbf16> to vector<64x32xbf16>
    %cst_70 = arith.constant dense<0.000000e+00> : vector<16x32xf32>
    %160 = tpu.matmul %157, %159, %cst_70 {dimension_numbers = #tpu.dot_dimension_numbers<[1], [0], [0], [1], [0, 0, 1, 1], [], []>} : vector<16x64xbf16>, vector<64x32xbf16>, vector<16x32xf32> -> vector<16x32xf32>
    %c0_71 = arith.constant 0 : index
    %c0_72 = arith.constant 0 : index
    %c0_73 = arith.constant 0 : index
    %161 = vector.load %arg14[%c0_71, %c0_72, %c0_73] : memref<2x1x32xf32, #tpu.memory_space<vmem>>, vector<1x1x32xf32>
    %162 = vector.shape_cast %161 : vector<1x1x32xf32> to vector<1x32xf32>
    %163 = vector.broadcast %162 : vector<1x32xf32> to vector<16x32xf32>
    %164 = arith.addf %160, %163 : vector<16x32xf32>
    %165 = arith.addf %146, %164 : vector<16x32xf32>
    %c0_74 = arith.constant 0 : index
    %c0_75 = arith.constant 0 : index
    %c0_76 = arith.constant 0 : index
    %166 = vector.load %arg17[%c0_74, %c0_75, %c0_76] : memref<2x1x32xf32, #tpu.memory_space<vmem>>, vector<1x1x32xf32>
    %167 = vector.shape_cast %166 : vector<1x1x32xf32> to vector<1x32xf32>
    %c0_77 = arith.constant 0 : index
    %c0_78 = arith.constant 0 : index
    %c0_79 = arith.constant 0 : index
    %168 = vector.load %arg18[%c0_77, %c0_78, %c0_79] : memref<2x1x32xf32, #tpu.memory_space<vmem>>, vector<1x1x32xf32>
    %169 = vector.shape_cast %168 : vector<1x1x32xf32> to vector<1x32xf32>
    %cst_80 = arith.constant dense<0.000000e+00> : vector<16xf32>
    %170 = vector.multi_reduction <add>, %165, %cst_80 [1] : vector<16x32xf32> to vector<16xf32>
    %171 = vector.shape_cast %170 : vector<16xf32> to vector<16x1xf32>
    %cst_81 = arith.constant 3.200000e+01 : f32
    %172 = vector.broadcast %cst_81 : f32 to vector<16x1xf32>
    %173 = arith.divf %171, %172 : vector<16x1xf32>
    %174 = vector.broadcast %173 : vector<16x1xf32> to vector<16x32xf32>
    %175 = arith.subf %165, %174 : vector<16x32xf32>
    %176 = arith.mulf %175, %175 : vector<16x32xf32>
    %cst_82 = arith.constant dense<0.000000e+00> : vector<16xf32>
    %177 = vector.multi_reduction <add>, %176, %cst_82 [1] : vector<16x32xf32> to vector<16xf32>
    %178 = vector.shape_cast %177 : vector<16xf32> to vector<16x1xf32>
    %cst_83 = arith.constant 3.200000e+01 : f32
    %179 = vector.broadcast %cst_83 : f32 to vector<16x1xf32>
    %180 = arith.divf %178, %179 : vector<16x1xf32>
    %cst_84 = arith.constant 9.99999974E-6 : f32
    %181 = vector.broadcast %cst_84 : f32 to vector<16x1xf32>
    %182 = arith.addf %180, %181 : vector<16x1xf32>
    %183 = math.rsqrt %182 : vector<16x1xf32>
    %184 = vector.broadcast %183 : vector<16x1xf32> to vector<16x32xf32>
    %185 = arith.mulf %175, %184 : vector<16x32xf32>
    %186 = vector.broadcast %167 : vector<1x32xf32> to vector<16x32xf32>
    %187 = arith.mulf %185, %186 : vector<16x32xf32>
    %188 = vector.broadcast %169 : vector<1x32xf32> to vector<16x32xf32>
    %189 = arith.addf %187, %188 : vector<16x32xf32>
    %190 = arith.truncf %189 : vector<16x32xf32> to vector<16x32xbf16>
    %c1 = arith.constant 1 : index
    %c0_85 = arith.constant 0 : index
    %c0_86 = arith.constant 0 : index
    %191 = vector.load %arg6[%c1, %c0_85, %c0_86] : memref<2x32x64xbf16, #tpu.memory_space<vmem>>, vector<1x32x64xbf16>
    %192 = vector.shape_cast %191 : vector<1x32x64xbf16> to vector<32x64xbf16>
    %cst_87 = arith.constant dense<0.000000e+00> : vector<16x64xf32>
    %193 = tpu.matmul %190, %192, %cst_87 {dimension_numbers = #tpu.dot_dimension_numbers<[1], [0], [0], [1], [0, 0, 1, 1], [], []>} : vector<16x32xbf16>, vector<32x64xbf16>, vector<16x64xf32> -> vector<16x64xf32>
    %c1_88 = arith.constant 1 : index
    %c0_89 = arith.constant 0 : index
    %c0_90 = arith.constant 0 : index
    %194 = vector.load %arg7[%c1_88, %c0_89, %c0_90] : memref<2x1x64xf32, #tpu.memory_space<vmem>>, vector<1x1x64xf32>
    %195 = vector.shape_cast %194 : vector<1x1x64xf32> to vector<1x64xf32>
    %196 = vector.broadcast %195 : vector<1x64xf32> to vector<16x64xf32>
    %197 = arith.addf %193, %196 : vector<16x64xf32>
    %c1_91 = arith.constant 1 : index
    %c0_92 = arith.constant 0 : index
    %c0_93 = arith.constant 0 : index
    %198 = vector.load %arg8[%c1_91, %c0_92, %c0_93] : memref<2x32x128xbf16, #tpu.memory_space<vmem>>, vector<1x32x128xbf16>
    %199 = vector.shape_cast %198 : vector<1x32x128xbf16> to vector<32x128xbf16>
    %cst_94 = arith.constant dense<0.000000e+00> : vector<16x128xf32>
    %200 = tpu.matmul %190, %199, %cst_94 {dimension_numbers = #tpu.dot_dimension_numbers<[1], [0], [0], [1], [0, 0, 1, 1], [], []>} : vector<16x32xbf16>, vector<32x128xbf16>, vector<16x128xf32> -> vector<16x128xf32>
    %c1_95 = arith.constant 1 : index
    %c0_96 = arith.constant 0 : index
    %c0_97 = arith.constant 0 : index
    %201 = vector.load %arg9[%c1_95, %c0_96, %c0_97] : memref<2x1x128xf32, #tpu.memory_space<vmem>>, vector<1x1x128xf32>
    %202 = vector.shape_cast %201 : vector<1x1x128xf32> to vector<1x128xf32>
    %203 = vector.broadcast %202 : vector<1x128xf32> to vector<16x128xf32>
    %204 = arith.addf %200, %203 : vector<16x128xf32>
    %205 = vector.extract_strided_slice %197 {offsets = [0, 0], sizes = [16, 32], strides = [1, 1]} : vector<16x64xf32> to vector<16x32xf32>
    %206 = arith.truncf %205 : vector<16x32xf32> to vector<16x32xbf16>
    %207 = vector.extract_strided_slice %197 {offsets = [0, 32], sizes = [16, 32], strides = [1, 1]} : vector<16x64xf32> to vector<16x32xf32>
    %208 = arith.truncf %207 : vector<16x32xf32> to vector<16x32xbf16>
    %209 = arith.truncf %204 : vector<16x128xf32> to vector<16x128xbf16>
    %cst_98 = arith.constant 0.000000e+00 : f32
    %210 = vector.broadcast %cst_98 : f32 to vector<16x32xf32>
    %211 = vector.extract_strided_slice %206 {offsets = [0, 0], sizes = [16, 8], strides = [1, 1]} : vector<16x32xbf16> to vector<16x8xbf16>
    %212 = vector.extract_strided_slice %208 {offsets = [0, 0], sizes = [16, 8], strides = [1, 1]} : vector<16x32xbf16> to vector<16x8xbf16>
    "tpu.trace_start"() <{level = 10 : i32, message = "qd,kd->qk"}> : () -> ()
    %cst_99 = arith.constant dense<0.000000e+00> : vector<16x16xf32>
    %213 = tpu.matmul %211, %212, %cst_99 {dimension_numbers = #tpu.dot_dimension_numbers<[1], [1], [0], [0], [0, 0, 1, 0], [], []>} : vector<16x8xbf16>, vector<16x8xbf16>, vector<16x16xf32> -> vector<16x16xf32>
    "tpu.trace_stop"() : () -> ()
    %214 = arith.addf %213, %24 : vector<16x16xf32>
    %cst_100 = arith.constant dense<0xFF800000> : vector<16xf32>
    %215 = vector.multi_reduction <maximumf>, %214, %cst_100 [1] : vector<16x16xf32> to vector<16xf32>
    %216 = vector.shape_cast %215 : vector<16xf32> to vector<16x1xf32>
    %217 = vector.broadcast %216 : vector<16x1xf32> to vector<16x16xf32>
    %218 = arith.subf %214, %217 : vector<16x16xf32>
    %219 = math.exp %218 : vector<16x16xf32>
    %cst_101 = arith.constant dense<0.000000e+00> : vector<16xf32>
    %220 = vector.multi_reduction <add>, %219, %cst_101 [1] : vector<16x16xf32> to vector<16xf32>
    %221 = vector.shape_cast %220 : vector<16xf32> to vector<16x1xf32>
    %222 = tpu.reciprocal %221 {approx = true} : vector<16x1xf32> -> vector<16x1xf32>
    %223 = vector.broadcast %222 : vector<16x1xf32> to vector<16x16xf32>
    %224 = arith.mulf %219, %223 : vector<16x16xf32>
    %225 = arith.truncf %224 : vector<16x16xf32> to vector<16x16xbf16>
    %226 = vector.extract_strided_slice %209 {offsets = [0, 0], sizes = [16, 32], strides = [1, 1]} : vector<16x128xbf16> to vector<16x32xbf16>
    %cst_102 = arith.constant dense<0.000000e+00> : vector<16x32xf32>
    %227 = tpu.matmul %225, %226, %cst_102 {dimension_numbers = #tpu.dot_dimension_numbers<[1], [0], [0], [1], [0, 0, 1, 1], [], []>} : vector<16x16xbf16>, vector<16x32xbf16>, vector<16x32xf32> -> vector<16x32xf32>
    %228 = arith.addf %210, %227 : vector<16x32xf32>
    %229 = vector.extract_strided_slice %206 {offsets = [0, 8], sizes = [16, 8], strides = [1, 1]} : vector<16x32xbf16> to vector<16x8xbf16>
    %230 = vector.extract_strided_slice %208 {offsets = [0, 8], sizes = [16, 8], strides = [1, 1]} : vector<16x32xbf16> to vector<16x8xbf16>
    "tpu.trace_start"() <{level = 10 : i32, message = "qd,kd->qk"}> : () -> ()
    %cst_103 = arith.constant dense<0.000000e+00> : vector<16x16xf32>
    %231 = tpu.matmul %229, %230, %cst_103 {dimension_numbers = #tpu.dot_dimension_numbers<[1], [1], [0], [0], [0, 0, 1, 0], [], []>} : vector<16x8xbf16>, vector<16x8xbf16>, vector<16x16xf32> -> vector<16x16xf32>
    "tpu.trace_stop"() : () -> ()
    %232 = arith.addf %231, %24 : vector<16x16xf32>
    %cst_104 = arith.constant dense<0xFF800000> : vector<16xf32>
    %233 = vector.multi_reduction <maximumf>, %232, %cst_104 [1] : vector<16x16xf32> to vector<16xf32>
    %234 = vector.shape_cast %233 : vector<16xf32> to vector<16x1xf32>
    %235 = vector.broadcast %234 : vector<16x1xf32> to vector<16x16xf32>
    %236 = arith.subf %232, %235 : vector<16x16xf32>
    %237 = math.exp %236 : vector<16x16xf32>
    %cst_105 = arith.constant dense<0.000000e+00> : vector<16xf32>
    %238 = vector.multi_reduction <add>, %237, %cst_105 [1] : vector<16x16xf32> to vector<16xf32>
    %239 = vector.shape_cast %238 : vector<16xf32> to vector<16x1xf32>
    %240 = tpu.reciprocal %239 {approx = true} : vector<16x1xf32> -> vector<16x1xf32>
    %241 = vector.broadcast %240 : vector<16x1xf32> to vector<16x16xf32>
    %242 = arith.mulf %237, %241 : vector<16x16xf32>
    %243 = arith.truncf %242 : vector<16x16xf32> to vector<16x16xbf16>
    %244 = vector.extract_strided_slice %209 {offsets = [0, 32], sizes = [16, 32], strides = [1, 1]} : vector<16x128xbf16> to vector<16x32xbf16>
    %cst_106 = arith.constant dense<0.000000e+00> : vector<16x32xf32>
    %245 = tpu.matmul %243, %244, %cst_106 {dimension_numbers = #tpu.dot_dimension_numbers<[1], [0], [0], [1], [0, 0, 1, 1], [], []>} : vector<16x16xbf16>, vector<16x32xbf16>, vector<16x32xf32> -> vector<16x32xf32>
    %246 = arith.addf %228, %245 : vector<16x32xf32>
    %247 = vector.extract_strided_slice %206 {offsets = [0, 16], sizes = [16, 8], strides = [1, 1]} : vector<16x32xbf16> to vector<16x8xbf16>
    %248 = vector.extract_strided_slice %208 {offsets = [0, 16], sizes = [16, 8], strides = [1, 1]} : vector<16x32xbf16> to vector<16x8xbf16>
    "tpu.trace_start"() <{level = 10 : i32, message = "qd,kd->qk"}> : () -> ()
    %cst_107 = arith.constant dense<0.000000e+00> : vector<16x16xf32>
    %249 = tpu.matmul %247, %248, %cst_107 {dimension_numbers = #tpu.dot_dimension_numbers<[1], [1], [0], [0], [0, 0, 1, 0], [], []>} : vector<16x8xbf16>, vector<16x8xbf16>, vector<16x16xf32> -> vector<16x16xf32>
    "tpu.trace_stop"() : () -> ()
    %250 = arith.addf %249, %24 : vector<16x16xf32>
    %cst_108 = arith.constant dense<0xFF800000> : vector<16xf32>
    %251 = vector.multi_reduction <maximumf>, %250, %cst_108 [1] : vector<16x16xf32> to vector<16xf32>
    %252 = vector.shape_cast %251 : vector<16xf32> to vector<16x1xf32>
    %253 = vector.broadcast %252 : vector<16x1xf32> to vector<16x16xf32>
    %254 = arith.subf %250, %253 : vector<16x16xf32>
    %255 = math.exp %254 : vector<16x16xf32>
    %cst_109 = arith.constant dense<0.000000e+00> : vector<16xf32>
    %256 = vector.multi_reduction <add>, %255, %cst_109 [1] : vector<16x16xf32> to vector<16xf32>
    %257 = vector.shape_cast %256 : vector<16xf32> to vector<16x1xf32>
    %258 = tpu.reciprocal %257 {approx = true} : vector<16x1xf32> -> vector<16x1xf32>
    %259 = vector.broadcast %258 : vector<16x1xf32> to vector<16x16xf32>
    %260 = arith.mulf %255, %259 : vector<16x16xf32>
    %261 = arith.truncf %260 : vector<16x16xf32> to vector<16x16xbf16>
    %262 = vector.extract_strided_slice %209 {offsets = [0, 64], sizes = [16, 32], strides = [1, 1]} : vector<16x128xbf16> to vector<16x32xbf16>
    %cst_110 = arith.constant dense<0.000000e+00> : vector<16x32xf32>
    %263 = tpu.matmul %261, %262, %cst_110 {dimension_numbers = #tpu.dot_dimension_numbers<[1], [0], [0], [1], [0, 0, 1, 1], [], []>} : vector<16x16xbf16>, vector<16x32xbf16>, vector<16x32xf32> -> vector<16x32xf32>
    %264 = arith.addf %246, %263 : vector<16x32xf32>
    %265 = vector.extract_strided_slice %206 {offsets = [0, 24], sizes = [16, 8], strides = [1, 1]} : vector<16x32xbf16> to vector<16x8xbf16>
    %266 = vector.extract_strided_slice %208 {offsets = [0, 24], sizes = [16, 8], strides = [1, 1]} : vector<16x32xbf16> to vector<16x8xbf16>
    "tpu.trace_start"() <{level = 10 : i32, message = "qd,kd->qk"}> : () -> ()
    %cst_111 = arith.constant dense<0.000000e+00> : vector<16x16xf32>
    %267 = tpu.matmul %265, %266, %cst_111 {dimension_numbers = #tpu.dot_dimension_numbers<[1], [1], [0], [0], [0, 0, 1, 0], [], []>} : vector<16x8xbf16>, vector<16x8xbf16>, vector<16x16xf32> -> vector<16x16xf32>
    "tpu.trace_stop"() : () -> ()
    %268 = arith.addf %267, %24 : vector<16x16xf32>
    %cst_112 = arith.constant dense<0xFF800000> : vector<16xf32>
    %269 = vector.multi_reduction <maximumf>, %268, %cst_112 [1] : vector<16x16xf32> to vector<16xf32>
    %270 = vector.shape_cast %269 : vector<16xf32> to vector<16x1xf32>
    %271 = vector.broadcast %270 : vector<16x1xf32> to vector<16x16xf32>
    %272 = arith.subf %268, %271 : vector<16x16xf32>
    %273 = math.exp %272 : vector<16x16xf32>
    %cst_113 = arith.constant dense<0.000000e+00> : vector<16xf32>
    %274 = vector.multi_reduction <add>, %273, %cst_113 [1] : vector<16x16xf32> to vector<16xf32>
    %275 = vector.shape_cast %274 : vector<16xf32> to vector<16x1xf32>
    %276 = tpu.reciprocal %275 {approx = true} : vector<16x1xf32> -> vector<16x1xf32>
    %277 = vector.broadcast %276 : vector<16x1xf32> to vector<16x16xf32>
    %278 = arith.mulf %273, %277 : vector<16x16xf32>
    %279 = arith.truncf %278 : vector<16x16xf32> to vector<16x16xbf16>
    %280 = vector.extract_strided_slice %209 {offsets = [0, 96], sizes = [16, 32], strides = [1, 1]} : vector<16x128xbf16> to vector<16x32xbf16>
    %cst_114 = arith.constant dense<0.000000e+00> : vector<16x32xf32>
    %281 = tpu.matmul %279, %280, %cst_114 {dimension_numbers = #tpu.dot_dimension_numbers<[1], [0], [0], [1], [0, 0, 1, 1], [], []>} : vector<16x16xbf16>, vector<16x32xbf16>, vector<16x32xf32> -> vector<16x32xf32>
    %282 = arith.addf %264, %281 : vector<16x32xf32>
    %c1_115 = arith.constant 1 : index
    %c0_116 = arith.constant 0 : index
    %c0_117 = arith.constant 0 : index
    %283 = vector.load %arg10[%c1_115, %c0_116, %c0_117] : memref<2x1x32xf32, #tpu.memory_space<vmem>>, vector<1x1x32xf32>
    %284 = vector.shape_cast %283 : vector<1x1x32xf32> to vector<1x32xf32>
    %285 = vector.broadcast %284 : vector<1x32xf32> to vector<16x32xf32>
    %286 = arith.addf %282, %285 : vector<16x32xf32>
    %287 = arith.addf %189, %286 : vector<16x32xf32>
    %c1_118 = arith.constant 1 : index
    %c0_119 = arith.constant 0 : index
    %c0_120 = arith.constant 0 : index
    %288 = vector.load %arg15[%c1_118, %c0_119, %c0_120] : memref<2x1x32xf32, #tpu.memory_space<vmem>>, vector<1x1x32xf32>
    %289 = vector.shape_cast %288 : vector<1x1x32xf32> to vector<1x32xf32>
    %c1_121 = arith.constant 1 : index
    %c0_122 = arith.constant 0 : index
    %c0_123 = arith.constant 0 : index
    %290 = vector.load %arg16[%c1_121, %c0_122, %c0_123] : memref<2x1x32xf32, #tpu.memory_space<vmem>>, vector<1x1x32xf32>
    %291 = vector.shape_cast %290 : vector<1x1x32xf32> to vector<1x32xf32>
    %cst_124 = arith.constant dense<0.000000e+00> : vector<16xf32>
    %292 = vector.multi_reduction <add>, %287, %cst_124 [1] : vector<16x32xf32> to vector<16xf32>
    %293 = vector.shape_cast %292 : vector<16xf32> to vector<16x1xf32>
    %cst_125 = arith.constant 3.200000e+01 : f32
    %294 = vector.broadcast %cst_125 : f32 to vector<16x1xf32>
    %295 = arith.divf %293, %294 : vector<16x1xf32>
    %296 = vector.broadcast %295 : vector<16x1xf32> to vector<16x32xf32>
    %297 = arith.subf %287, %296 : vector<16x32xf32>
    %298 = arith.mulf %297, %297 : vector<16x32xf32>
    %cst_126 = arith.constant dense<0.000000e+00> : vector<16xf32>
    %299 = vector.multi_reduction <add>, %298, %cst_126 [1] : vector<16x32xf32> to vector<16xf32>
    %300 = vector.shape_cast %299 : vector<16xf32> to vector<16x1xf32>
    %cst_127 = arith.constant 3.200000e+01 : f32
    %301 = vector.broadcast %cst_127 : f32 to vector<16x1xf32>
    %302 = arith.divf %300, %301 : vector<16x1xf32>
    %cst_128 = arith.constant 9.99999974E-6 : f32
    %303 = vector.broadcast %cst_128 : f32 to vector<16x1xf32>
    %304 = arith.addf %302, %303 : vector<16x1xf32>
    %305 = math.rsqrt %304 : vector<16x1xf32>
    %306 = vector.broadcast %305 : vector<16x1xf32> to vector<16x32xf32>
    %307 = arith.mulf %297, %306 : vector<16x32xf32>
    %308 = vector.broadcast %289 : vector<1x32xf32> to vector<16x32xf32>
    %309 = arith.mulf %307, %308 : vector<16x32xf32>
    %310 = vector.broadcast %291 : vector<1x32xf32> to vector<16x32xf32>
    %311 = arith.addf %309, %310 : vector<16x32xf32>
    %312 = arith.truncf %311 : vector<16x32xf32> to vector<16x32xbf16>
    %c1_129 = arith.constant 1 : index
    %c0_130 = arith.constant 0 : index
    %c0_131 = arith.constant 0 : index
    %313 = vector.load %arg11[%c1_129, %c0_130, %c0_131] : memref<2x32x64xbf16, #tpu.memory_space<vmem>>, vector<1x32x64xbf16>
    %314 = vector.shape_cast %313 : vector<1x32x64xbf16> to vector<32x64xbf16>
    %cst_132 = arith.constant dense<0.000000e+00> : vector<16x64xf32>
    %315 = tpu.matmul %312, %314, %cst_132 {dimension_numbers = #tpu.dot_dimension_numbers<[1], [0], [0], [1], [0, 0, 1, 1], [], []>} : vector<16x32xbf16>, vector<32x64xbf16>, vector<16x64xf32> -> vector<16x64xf32>
    %c1_133 = arith.constant 1 : index
    %c0_134 = arith.constant 0 : index
    %c0_135 = arith.constant 0 : index
    %316 = vector.load %arg12[%c1_133, %c0_134, %c0_135] : memref<2x1x64xf32, #tpu.memory_space<vmem>>, vector<1x1x64xf32>
    %317 = vector.shape_cast %316 : vector<1x1x64xf32> to vector<1x64xf32>
    %318 = vector.broadcast %317 : vector<1x64xf32> to vector<16x64xf32>
    %319 = arith.addf %315, %318 : vector<16x64xf32>
    %cst_136 = arith.constant 0.000000e+00 : f32
    %320 = vector.broadcast %cst_136 : f32 to vector<16x64xf32>
    %321 = arith.maximumf %319, %320 : vector<16x64xf32>
    %322 = arith.truncf %321 : vector<16x64xf32> to vector<16x64xbf16>
    %c1_137 = arith.constant 1 : index
    %c0_138 = arith.constant 0 : index
    %c0_139 = arith.constant 0 : index
    %323 = vector.load %arg13[%c1_137, %c0_138, %c0_139] : memref<2x64x32xbf16, #tpu.memory_space<vmem>>, vector<1x64x32xbf16>
    %324 = vector.shape_cast %323 : vector<1x64x32xbf16> to vector<64x32xbf16>
    %cst_140 = arith.constant dense<0.000000e+00> : vector<16x32xf32>
    %325 = tpu.matmul %322, %324, %cst_140 {dimension_numbers = #tpu.dot_dimension_numbers<[1], [0], [0], [1], [0, 0, 1, 1], [], []>} : vector<16x64xbf16>, vector<64x32xbf16>, vector<16x32xf32> -> vector<16x32xf32>
    %c1_141 = arith.constant 1 : index
    %c0_142 = arith.constant 0 : index
    %c0_143 = arith.constant 0 : index
    %326 = vector.load %arg14[%c1_141, %c0_142, %c0_143] : memref<2x1x32xf32, #tpu.memory_space<vmem>>, vector<1x1x32xf32>
    %327 = vector.shape_cast %326 : vector<1x1x32xf32> to vector<1x32xf32>
    %328 = vector.broadcast %327 : vector<1x32xf32> to vector<16x32xf32>
    %329 = arith.addf %325, %328 : vector<16x32xf32>
    %330 = arith.addf %311, %329 : vector<16x32xf32>
    %c1_144 = arith.constant 1 : index
    %c0_145 = arith.constant 0 : index
    %c0_146 = arith.constant 0 : index
    %331 = vector.load %arg17[%c1_144, %c0_145, %c0_146] : memref<2x1x32xf32, #tpu.memory_space<vmem>>, vector<1x1x32xf32>
    %332 = vector.shape_cast %331 : vector<1x1x32xf32> to vector<1x32xf32>
    %c1_147 = arith.constant 1 : index
    %c0_148 = arith.constant 0 : index
    %c0_149 = arith.constant 0 : index
    %333 = vector.load %arg18[%c1_147, %c0_148, %c0_149] : memref<2x1x32xf32, #tpu.memory_space<vmem>>, vector<1x1x32xf32>
    %334 = vector.shape_cast %333 : vector<1x1x32xf32> to vector<1x32xf32>
    %cst_150 = arith.constant dense<0.000000e+00> : vector<16xf32>
    %335 = vector.multi_reduction <add>, %330, %cst_150 [1] : vector<16x32xf32> to vector<16xf32>
    %336 = vector.shape_cast %335 : vector<16xf32> to vector<16x1xf32>
    %cst_151 = arith.constant 3.200000e+01 : f32
    %337 = vector.broadcast %cst_151 : f32 to vector<16x1xf32>
    %338 = arith.divf %336, %337 : vector<16x1xf32>
    %339 = vector.broadcast %338 : vector<16x1xf32> to vector<16x32xf32>
    %340 = arith.subf %330, %339 : vector<16x32xf32>
    %341 = arith.mulf %340, %340 : vector<16x32xf32>
    %cst_152 = arith.constant dense<0.000000e+00> : vector<16xf32>
    %342 = vector.multi_reduction <add>, %341, %cst_152 [1] : vector<16x32xf32> to vector<16xf32>
    %343 = vector.shape_cast %342 : vector<16xf32> to vector<16x1xf32>
    %cst_153 = arith.constant 3.200000e+01 : f32
    %344 = vector.broadcast %cst_153 : f32 to vector<16x1xf32>
    %345 = arith.divf %343, %344 : vector<16x1xf32>
    %cst_154 = arith.constant 9.99999974E-6 : f32
    %346 = vector.broadcast %cst_154 : f32 to vector<16x1xf32>
    %347 = arith.addf %345, %346 : vector<16x1xf32>
    %348 = math.rsqrt %347 : vector<16x1xf32>
    %349 = vector.broadcast %348 : vector<16x1xf32> to vector<16x32xf32>
    %350 = arith.mulf %340, %349 : vector<16x32xf32>
    %351 = vector.broadcast %332 : vector<1x32xf32> to vector<16x32xf32>
    %352 = arith.mulf %350, %351 : vector<16x32xf32>
    %353 = vector.broadcast %334 : vector<1x32xf32> to vector<16x32xf32>
    %354 = arith.addf %352, %353 : vector<16x32xf32>
    %355 = arith.truncf %354 : vector<16x32xf32> to vector<16x32xbf16>
    %c0_155 = arith.constant 0 : index
    %c0_156 = arith.constant 0 : index
    %356 = vector.load %arg19[%c0_155, %c0_156] : memref<32x128xbf16, #tpu.memory_space<vmem>>, vector<32x128xbf16>
    %cst_157 = arith.constant dense<0.000000e+00> : vector<16x128xf32>
    %357 = tpu.matmul %355, %356, %cst_157 {dimension_numbers = #tpu.dot_dimension_numbers<[1], [0], [0], [1], [0, 0, 1, 1], [], []>} : vector<16x32xbf16>, vector<32x128xbf16>, vector<16x128xf32> -> vector<16x128xf32>
    %c0_158 = arith.constant 0 : index
    %c0_159 = arith.constant 0 : index
    %358 = vector.load %arg20[%c0_158, %c0_159] : memref<1x128xf32, #tpu.memory_space<vmem>>, vector<1x128xf32>
    %359 = vector.broadcast %358 : vector<1x128xf32> to vector<16x128xf32>
    %360 = arith.addf %357, %359 : vector<16x128xf32>
    %c0_160 = arith.constant 0 : index
    %c0_161 = arith.constant 0 : index
    %361 = vector.load %arg21[%c0_160, %c0_161] : memref<16x128xf32, #tpu.memory_space<vmem>>, vector<16x128xf32>
    tpu.vector_store %arg21[%c0_160, %c0_161], %360 {strides = array<i32>} : memref<16x128xf32, #tpu.memory_space<vmem>>, vector<16x128xf32>,
    return
  }
}

</mosaic_0001>

<bundles_post_ra>
// kernel: tener_forward.1
= control target key start
LH: loop header
LB: loop body
LE: loop exit
PB: predicated region body
PF: predicated region fallthrough
CT: control target
= control target key end

     0   :  { %v2518_v0 = vmov 0   ;;  %v2519_v2 = vmov 0.0   ;;  %v71_v4 = vlaneseq  ;;  %vm2520_vm1 = vmmov 0   ;;  %s2528_s25 = smov 72   ;;  %s3100_s27 = smov 32   ;;  %s3073_s0 = inlined_call_operand.vmem [shape: s32[16,1], index: 0, kind: input, shape index: {}]   ;;  %s3074_s4 = inlined_call_operand.vmem [shape: bf16[50,32], index: 4, kind: input, shape index: {}]   ;;  %s3075_s2 = inlined_call_operand.vmem [shape: s32[16,1], index: 2, kind: input, shape index: {}]   ;;  %s3076_s1 = inlined_call_operand.vmem [shape: f32[1,16], index: 1, kind: input, shape index: {}]   ;;  %s3077_s6 = inlined_call_operand.vmem [shape: bf16[2,32,64], index: 6, kind: input, shape index: {}]   ;;  %s3078_s8 = inlined_call_operand.vmem [shape: bf16[2,32,128], index: 8, kind: input, shape index: {}]   ;;  %s3079_s5 = inlined_call_operand.vmem [shape: f32[1,32], index: 5, kind: input, shape index: {}]   ;;  %s3080_s7 = inlined_call_operand.vmem [shape: f32[2,1,64], index: 7, kind: input, shape index: {}]   ;;  %s3081_s9 = inlined_call_operand.vmem [shape: f32[2,1,128], index: 9, kind: input, shape index: {}]   ;;  %s3082_s3 = inlined_call_operand.vmem [shape: s32[1,16], index: 3, kind: input, shape index: {}]   ;;  %s3083_s10 = inlined_call_operand.vmem [shape: f32[2,1,32], index: 10, kind: input, shape index: {}]   ;;  %s3084_s11 = inlined_call_operand.vmem [shape: bf16[2,32,64], index: 11, kind: input, shape index: {}]   ;;  %s3085_s13 = inlined_call_operand.vmem [shape: bf16[2,64,32], index: 13, kind: input, shape index: {}]   ;;  %s3086_s15 = inlined_call_operand.vmem [shape: f32[2,1,32], index: 15, kind: input, shape index: {}]   ;;  %s3087_s16 = inlined_call_operand.vmem [shape: f32[2,1,32], index: 16, kind: input, shape index: {}]   ;;  %s3088_s12 = inlined_call_operand.vmem [shape: f32[2,1,64], index: 12, kind: input, shape index: {}]   ;;  %s3089_s14 = inlined_call_operand.vmem [shape: f32[2,1,32], index: 14, kind: input, shape index: {}]   ;;  %s3090_s17 = inlined_call_operand.vmem [shape: f32[2,1,32], index: 17, kind: input, shape index: {}]   ;;  %s3091_s18 = inlined_call_operand.vmem [shape: f32[2,1,32], index: 18, kind: input, shape index: {}]   ;;  %s3092_s19 = inlined_call_operand.vmem [shape: bf16[32,128], index: 19, kind: input, shape index: {}]   ;;  %s3093_s20 = inlined_call_operand.vmem [shape: f32[1,128], index: 20, kind: input, shape index: {}]   ;;  %s3094_s21 = inlined_call_operand.vmem [shape: f32[16,128], index: 21, kind: output, shape index: {}]  }
   0x1   :  { %3102 = sst [smem:[#allocation2_spill]] %s3073_s0  ;;  %2410 = vset.pattern.permute.xlu0 %v2518_v0  ;;  %2209 = vmatprep.subr.bf16.mxu0 %v2519_v2  ;;  %vm125_vm2 = vcmask 1040384   ;;  %vm121_vm5 = vcmask 408576   ;;  %v2039_v24 = vld [vmem:[%s3079_s5] ss:$0 sm:$0xff]  ;;  %vm221_vm6 = vcmask 261120  }
   0x2   :  { %3103 = sst [smem:[#allocation3_spill]] %s3074_s4  ;;  %s3108_s26 = sld [smem:[#allocation2_spill]]  ;;  %2221 = vmatprep.subr.bf16.mxu1 %v2519_v2  ;;  %2411 = vset.pattern.permute.xlu1 %v2518_v0  ;;  %v189_v7 = vshrl.u32 %v71_v4, 7  ;;  %v72_v16 = vand.u32 127, %v71_v4  ;;  %v2046_v34 = vld [vmem:[%s3080_s7] ss:$0 sm:$0xff] }
   0x3   :  { %3104 = sst [smem:[#allocation4_spill]] %s3075_s2  ;;  %s3109_s28 = sld [smem:[#allocation3_spill]]  ;;  %2217 = vmatprep.mubr.msk.bf16.mxu0 %vm2520_vm1, %v2519_v2  ;;  %2225 = vmatprep.mubr.msk.bf16.mxu1 %vm2520_vm1, %v2519_v2  ;;  %v2050_v42 = vld [vmem:[%s3081_s9] ss:$0 sm:$0xff]  ;;  %vm335_vm7 = vcmask 64512   ;;  %vm383_vm13 = vcmask 130048  }
   0x4   :  { %3105 = sst [smem:[#allocation5_spill]] %s3076_s1  ;;  %v190_v9 = vsub.s32 0, %v189_v7  ;;  %s3111_s2 = sld [smem:[#allocation4_spill]]  ;;  %v2045_v54 = vld [vmem:[%s3082_s3] ss:$0 sm:$0xff]  ;;  %vm985_vm14 = vcmask 523264  }
   0x5   :  { %3106 = sst [smem:[#allocation6_spill]] %s3077_s6  ;;  %s3110_s23 = sld [smem:[#allocation5_spill]]  ;;  %v2523_v57 = vmov -1e+09  }
   0x6   :  { %3107 = sst [smem:[#allocation7_spill]] %s3078_s8  ;;  %s3112_s0 = sld [smem:[#allocation6_spill]] }
   0x7   :  { %s3113_s24 = sld [smem:[#allocation7_spill]]  ;;  %s2521_s1 = smov 88  }
   0x8   :  { %v69_v1 = vld [vmem:[%s3108_s26] sm:$0xff]  ;;  %v70_v5 = vld [vmem:[%s3108_s26 + $0x8] sm:$0xff]  ;;  %s2522_s6 = smov 120   ;;  %s2524_s3 = smov 96  }
   0x9   :  { %74 = vperm.xlu0 %2410, %v69_v1   ;;  %v2412_v3 = vld [vmem:[%s3109_s28] sm:$0xff]   ;;  %v2413_v6 = vld [vmem:[%s3109_s28 + $0x8] sm:$0xff]   ;;  %v2414_v11 = vld [vmem:[%s3109_s28 + $0x10] sm:$0xff]   ;;  %s2526_s4 = smov 112   ;;  %s2527_s5 = smov 104  }
   0xa   :  { %2210 = vmatpush3.bf16.msra.mxu0 %v2412_v3  ;;  %v170_v10 = vld [vmem:[%s3111_s2] sm:$0xff]  ;;  %v2415_v13 = vld [vmem:[%s3109_s28 + $0x18] ss:$0 sps:$4 sm:$0x11]   ;;  %v171_v49 = vld [vmem:[%s3111_s2 + $0x8] sm:$0xff]  ;;  %s3101_s26 = smov 64  }
   0xb   :  { %2211 = vmatprep.subr.bf16.mxu0 %v2519_v2  ;;  %v185_v8 = vld [vmem:[%s3110_s23] sm:$0x1]  ;;  %v127_v15 = vsel %vm125_vm2, %v2415_v13, 0  ;;  %s2525_s23 = smov 80  }
   0xc   :  { %vm186_vm0 = vcmp.gt.f32.partialorder %v185_v8, 0.5  ;;  %v2416_v22 = vld [vmem:[%s3112_s0] sm:$0xff]   ;;  %v2417_v23 = vld [vmem:[%s3112_s0 + $0x8] sm:$0xff]  }
   0xd   :  { %77 = vperm.xlu0 %2410, %v70_v5   ;;  %v187_v12 = vsel %vm186_vm0, 1, %v2518_v0  ;;  %2222 = vmatpush3.bf16.msra.mxu1 %v2416_v22  ;;  %v2418_v31 = vld [vmem:[%s3113_s24] sm:$0xff]   ;;  %v2419_v33 = vld [vmem:[%s3113_s24 + $0x8] sm:$0xff]  }
   0xe   :  { %2212 = vmatpush3.bf16.msra.mxu0 %v2413_v6  ;;  %v2671_v14 = vrot.slane %v187_v12, %v190_v9  ;;  %2223 = vmatprep.subr.bf16.mxu1 %v2519_v2 }
   0xf   :  { %2213 = vmatprep.subr.bf16.mxu0 %v2519_v2 }
  0x10   :  { %vm192_vm8 = vcmp.eq.s32.totalorder %v2671_v14, 1 }
  0x11   :  { %174 = vperm.xlu0 %2410, %v170_v10   ;;  %2224 = vmatpush3.bf16.msra.mxu1 %v2417_v23 }
  0x12   :  { %2214 = vmatpush3.bf16.msra.mxu0 %v2414_v11  ;;  %2229 = vmatprep.subr.bf16.mxu1 %v2519_v2 }
  0x13   :  { %2215 = vmatprep.subr.bf16.mxu0 %v2519_v2 }
  0x16   :  { %2216 = vmatpush3.bf16.msra.mxu0 %v127_v15 }
  0x17   :  { %2237 = vmatprep.subr.bf16.mxu0 %v2519_v2 }
  0x88   :  { %v75_v17 = vpop.permute.xlu0 %74 }
  0x89   :  { %vm79_vm3 = vcmp.eq.s32.totalorder %v72_v16, %v75_v17 }
  0x8a   :  { %v2037_v19 = vsel %vm79_vm3, 1.0, %v2519_v2 }
  0x8c   :  { %v78_v18 = vpop.permute.xlu0 %77 }
  0x8d   :  { %vm80_vm4 = vcmp.eq.s32.totalorder %v72_v16, %v78_v18 }
  0x8e   :  { %v2038_v20 = vsel %vm80_vm4, 1.0, %v2519_v2 }
  0x8f   :  { %v85_v21 = vpack.c.bf16 %v2038_v20, %v2037_v19 }
  0x90   :  { %v175_v55 = vpop.permute.xlu0 %174 }
  0x91   :  { %2218 = vmatmul.mubr.msk.bf16.vlgmr.msra.gmra.mrb[0].mxu0 %vm121_vm5, %v85_v21  ;;  %vm183_vm9 = vcmp.eq.s32.totalorder %v175_v55, %v2045_v54 }
  0x92   :  { %2239 = vmatprep.mubr.msk.bf16.mxu0 %vm2520_vm1, %v2519_v2  ;;  %vm193_vm11 = vmand %vm183_vm9, %vm192_vm8 }
  0x93   :  { %v2740_v58 = vsel %vm193_vm11, 0.0, %v2523_v57 }
 0x164   :  { %v163_v25 = vpop.f32.mrb[0].mxu0 }
 0x165   :  { %v2219_v26 = vpop.f32.mrb[1].mxu0  ;;  %v2692_v28 = vadd.f32 %v2039_v24, %v163_v25 }
 0x166   :  { %v166_v27 = vpop.f32.mrb[2].mxu0 }
 0x167   :  { %v2694_v29 = vadd.f32 %v2039_v24, %v166_v27  ;;  %v2220_v30 = vpop.f32.mrb[3].mxu0 }
 0x169   :  { %v197_v32 = vpack.c.bf16 %v2694_v29, %v2692_v28 }
 0x16b   :  { %2226 = vmatmul.mubr.msk.bf16.vlgmr.msra.gmra.mrb[0].mxu1 %vm221_vm6, %v197_v32 }
 0x16c   :  { %2230 = vmatpush3.bf16.msra.mxu1 %v2418_v31  ;;  %2233 = vmatprep.mubr.msk.bf16.mxu1 %vm2520_vm1, %v2519_v2 }
 0x16d   :  { %2231 = vmatprep.subr.bf16.mxu1 %v2519_v2 }
 0x170   :  { %2232 = vmatpush3.bf16.msra.mxu1 %v2419_v33 }
 0x171   :  { %2243 = vmatprep.subr.bf16.mxu1 %v2519_v2 }
 0x173   :  { %2234 = vmatmul.mubr.msk.bf16.vlgmr.msra.gmra.mrb[4].mxu1 %vm221_vm6, %v197_v32 }
 0x174   :  { %2245 = vmatprep.mubr.msk.bf16.mxu1 %vm2520_vm1, %v2519_v2 }
 0x23e   :  { %v259_v35 = vpop.f32.mrb[0].mxu1 }
 0x23f   :  { %v2227_v36 = vpop.f32.mrb[1].mxu1  ;;  %v260_v38 = vadd.f32 %v2046_v34, %v259_v35 }
 0x240   :  { %v262_v37 = vpop.f32.mrb[2].mxu1 }
 0x241   :  { %v263_v39 = vadd.f32 %v2046_v34, %v262_v37  ;;  %v2228_v40 = vpop.f32.mrb[3].mxu1 }
 0x243   :  { %v2715_v41 = vpack.c.bf16 %v263_v39, %v260_v38 }
 0x245   :  { %409 = vrot.lane.b32.xlu1 %v2715_v41, %s2521_s1 }
 0x246   :  { %v323_v43 = vpop.f32.mrb[4].mxu1 }
 0x247   :  { %v2235_v44 = vpop.f32.mrb[5].mxu1  ;;  %v324_v46 = vadd.f32 %v2050_v42, %v323_v43 }
 0x248   :  { %v326_v45 = vpop.f32.mrb[6].mxu1 }
 0x249   :  { %v327_v47 = vadd.f32 %v2050_v42, %v326_v45  ;;  %407 = vrot.lane.b32.xlu1 %v2715_v41, %s2522_s6  ;;  %v2236_v48 = vpop.f32.mrb[7].mxu1 }
 0x24b   :  { %v2727_v50 = vpack.c.bf16 %v327_v47, %v324_v46 }
 0x24d   :  { %177 = vperm.xlu1 %2411, %v171_v49  }
 0x2b7   :  { %v410_v51 = vpop.permute.xlu1 %409 }
 0x2b8   :  { %v415_v52 = vsel %vm335_vm7, %v410_v51, 0 }
 0x2b9   :  { %2244 = vmatpush3.bf16.xpose.msra.mxu1 %v415_v52 }
 0x2ba   :  { %2255 = vmatprep.subr.bf16.mxu1 %v2519_v2 }
 0x2bb   :  { %v408_v53 = vpop.permute.xlu1 %407 }
 0x2c0   :  { %2246 = vmatmul.mubr.msk.bf16.vlgmr.msra.gmra.mrb[8].mxu1 %vm335_vm7, %v408_v53 }
 0x2c1   :  { %2256 = vmatpush3.bf16.msra.mxu1 %v2727_v50  ;;  %2257 = vmatprep.mubr.msk.bf16.mxu1 %vm2520_vm1, %v2519_v2 }
 0x2c2   :  { %2267 = vmatprep.subr.bf16.mxu1 %v2519_v2 }
 0x2cc   :  { %v178_v56 = vpop.permute.xlu1 %177 }
 0x2cd   :  { %vm184_vm10 = vcmp.eq.s32.totalorder %v178_v56, %v2045_v54 }
 0x2ce   :  { %vm194_vm12 = vmand %vm184_vm10, %vm192_vm8 }
 0x2cf   :  { %v2742_v59 = vsel %vm194_vm12, 0.0, %v2523_v57 }
 0x393   :  { %v451_v60 = vpop.f32.mrb[8].mxu1 }
 0x394   :  { %v452_v61 = vadd.f32 %v451_v60, %v2740_v58  ;;  %v2247_v62 = vpop.f32.mrb[9].mxu1 }
 0x395   :  { %v454_v63 = vpop.f32.mrb[10].mxu1 }
 0x396   :  { %v455_v0 = vadd.f32 %v454_v63, %v2742_v59  ;;  %v2248_v1 = vpop.f32.mrb[11].mxu1  ;;  %v458_v3 = vsel %vm383_vm13, %v452_v61, -inf }
 0x397   :  { %459 = vmax.xlane.f32.xlu0 %v458_v3 }
 0x398   :  { %v461_v4 = vsel %vm383_vm13, %v455_v0, -inf }
 0x399   :  { %462 = vmax.xlane.f32.xlu1 %v461_v4 }
 0x3aa   :  { %333 = vrot.lane.b32.xlu1 %v2715_v41, %s2524_s3 }
 0x3ae   :  { %575 = vrot.lane.b32.xlu1 %v2715_v41, %s2525_s23 }
 0x3b2   :  { %573 = vrot.lane.b32.xlu1 %v2715_v41, %s2526_s4 }
 0x3b6   :  { %696 = vrot.lane.b32.xlu1 %v2715_v41, %s2527_s5 }
 0x424   :  { %v460_v5 = vpop.xlane.xlu0 %459 }
 0x425   :  { %v464_v6 = vsub.f32 %v452_v61, %v460_v5 }
 0x426   :  { %v463_v7 = vpop.xlane.xlu1 %462 }
 0x427   :  { %v466_v8 = vmul.f32 1.442695, %v464_v6  ;;  %v465_v9 = vsub.f32 %v455_v0, %v463_v7 }
 0x429   :  { %2438 = vpow2.f32 %v466_v8  ;;  %v468_v10 = vmul.f32 1.442695, %v465_v9 }
 0x42a   :  { %v334_v11 = vpop.permute.xlu1 %333 }
 0x42b   :  { %2440 = vpow2.f32 %v468_v10  ;;  %v340_v12 = vsel %vm335_vm7, %v334_v11, 0 }
 0x42c   :  { %2238 = vmatpush3.bf16.xpose.msra.mxu0 %v340_v12 }
 0x42d   :  { %2249 = vmatprep.subr.bf16.mxu0 %v2519_v2 }
 0x42e   :  { %v576_v24 = vpop.permute.xlu1 %575 }
 0x42f   :  { %v581_v26 = vsel %vm335_vm7, %v576_v24, 0 }
 0x432   :  { %v574_v30 = vpop.permute.xlu1 %573 }
 0x433   :  { %v2439_v13 = vpop.eup %2438  ;;  %2240 = vmatmul.mubr.msk.bf16.vlgmr.msra.gmra.mrb[4].mxu0 %vm335_vm7, %v2715_v41 }
 0x434   :  { %v470_v14 = vsel %vm383_vm13, %v2439_v13, 0.0  ;;  %2251 = vmatprep.mubr.msk.bf16.mxu0 %vm2520_vm1, %v2519_v2 }
 0x435   :  { %v2441_v15 = vpop.eup %2440  ;;  %471 = vadd.xlane.f32.xlu0 %v470_v14 }
 0x436   :  { %v473_v16 = vsel %vm383_vm13, %v2441_v15, 0.0  ;;  %v697_v32 = vpop.permute.xlu1 %696 }
 0x439   :  { %474 = vadd.xlane.f32.xlu0 %v473_v16 }
 0x44f   :  { %482 = vrot.lane.b32.xlu0 %v2727_v50, %s2524_s3 }
 0x453   :  { %698 = vrot.lane.b32.xlu0 %v2715_v41, %s2528_s25 }
 0x4c2   :  { %v472_v17 = vpop.xlane.xlu0 %471 }
 0x4c3   :  { %2442 = vrcp.f32 %v472_v17 }
 0x4c6   :  { %v475_v18 = vpop.xlane.xlu0 %474 }
 0x4c7   :  { %2444 = vrcp.f32 %v475_v18 }
 0x4ca   :  { %v483_v19 = vpop.permute.xlu0 %482 }
 0x4cb   :  { %2250 = vmatpush3.bf16.msra.mxu0 %v483_v19 }
 0x4cc   :  { %2261 = vmatprep.subr.bf16.mxu0 %v2519_v2 }
 0x4cd   :  { %v2443_v20 = vpop.eup %2442 }
 0x4ce   :  { %v478_v22 = vmul.f32 %v2443_v20, %v2439_v13  ;;  %v699_v27 = vpop.permute.xlu0 %698 }
 0x4cf   :  { %v704_v31 = vsel %vm335_vm7, %v699_v27, 0 }
 0x4d1   :  { %v2445_v21 = vpop.eup %2444 }
 0x4d2   :  { %v479_v23 = vmul.f32 %v2445_v21, %v2441_v15 }
 0x4d4   :  { %v480_v25 = vpack.c.bf16 %v479_v23, %v478_v22 }
 0x4d6   :  { %2252 = vmatmul.mubr.msk.bf16.vlgmr.msra.gmra.mrb[8].mxu0 %vm383_vm13, %v480_v25 }
 0x4d7   :  { %2262 = vmatpush3.bf16.xpose.msra.mxu0 %v581_v26  ;;  %2263 = vmatprep.mubr.msk.bf16.mxu0 %vm2520_vm1, %v2519_v2 }
 0x4d8   :  { %2273 = vmatprep.subr.bf16.mxu0 %v2519_v2 }
 0x4de   :  { %2264 = vmatmul.mubr.msk.bf16.vlgmr.msra.gmra.mrb[12].mxu0 %vm335_vm7, %v574_v30 }
 0x4df   :  { %2274 = vmatpush3.bf16.xpose.msra.mxu0 %v704_v31  ;;  %2275 = vmatprep.mubr.msk.bf16.mxu0 %vm2520_vm1, %v2519_v2 }
 0x4e0   :  { %2285 = vmatprep.subr.bf16.mxu0 %v2519_v2 }
 0x4e6   :  { %2276 = vmatmul.mubr.msk.bf16.vlgmr.msra.gmra.mrb[16].mxu0 %vm335_vm7, %v697_v32 }
 0x4e7   :  { %2289 = vmatprep.mubr.msk.bf16.mxu0 %vm2520_vm1, %v2519_v2 }
 0x506   :  { %v376_v33 = vpop.f32.mrb[4].mxu0 }
 0x507   :  { %v377_v34 = vadd.f32 %v376_v33, %v2740_v58  ;;  %v2241_v35 = vpop.f32.mrb[5].mxu0 }
 0x508   :  { %v379_v36 = vpop.f32.mrb[6].mxu0 }
 0x509   :  { %v380_v37 = vadd.f32 %v379_v36, %v2742_v59  ;;  %v2242_v38 = vpop.f32.mrb[7].mxu0  ;;  %v384_v39 = vsel %vm383_vm13, %v377_v34, -inf }
 0x50a   :  { %385 = vmax.xlane.f32.xlu0 %v384_v39 }
 0x50b   :  { %v387_v40 = vsel %vm383_vm13, %v380_v37, -inf }
 0x50c   :  { %388 = vmax.xlane.f32.xlu1 %v387_v40 }
 0x597   :  { %v386_v41 = vpop.xlane.xlu0 %385 }
 0x598   :  { %v390_v45 = vsub.f32 %v377_v34, %v386_v41 }
 0x599   :  { %v389_v43 = vpop.xlane.xlu1 %388 }
 0x59a   :  { %v391_v48 = vsub.f32 %v380_v37, %v389_v43  ;;  %v392_v49 = vmul.f32 1.442695, %v390_v45 }
 0x59c   :  { %v394_v51 = vmul.f32 1.442695, %v391_v48  ;;  %2446 = vpow2.f32 %v392_v49 }
 0x59e   :  { %2448 = vpow2.f32 %v394_v51 }
 0x5a6   :  { %v2447_v6 = vpop.eup %2446 }
 0x5a7   :  { %v396_v9 = vsel %vm383_vm13, %v2447_v6, 0.0 }
 0x5a8   :  { %v2449_v8 = vpop.eup %2448 }
 0x5a9   :  { %v2786_v42 = vpop.f32.mrb[8].mxu0  ;;  %v399_v10 = vsel %vm383_vm13, %v2449_v8, 0.0 }
 0x5aa   :  { %v2253_v44 = vpop.f32.mrb[9].mxu0 }
 0x5ab   :  { %v2788_v46 = vpop.f32.mrb[10].mxu0 }
 0x5ac   :  { %v2254_v47 = vpop.f32.mrb[11].mxu0 }
 0x5b1   :  { %v617_v52 = vpop.f32.mrb[12].mxu0 }
 0x5b2   :  { %v618_v53 = vadd.f32 %v617_v52, %v2740_v58  ;;  %v2265_v54 = vpop.f32.mrb[13].mxu0 }
 0x5b3   :  { %v620_v55 = vpop.f32.mrb[14].mxu0 }
 0x5b4   :  { %v621_v56 = vadd.f32 %v620_v55, %v2742_v59  ;;  %v2266_v57 = vpop.f32.mrb[15].mxu0  ;;  %v624_v60 = vsel %vm383_vm13, %v618_v53, -inf }
 0x5b5   :  { %625 = vmax.xlane.f32.xlu0 %v624_v60 }
 0x5b6   :  { %v627_v61 = vsel %vm383_vm13, %v621_v56, -inf }
 0x5b9   :  { %v740_v62 = vpop.f32.mrb[16].mxu0  ;;  %628 = vmax.xlane.f32.xlu0 %v627_v61 }
 0x5ba   :  { %v741_v63 = vadd.f32 %v740_v62, %v2740_v58  ;;  %v2277_v0 = vpop.f32.mrb[17].mxu0 }
 0x5bb   :  { %v743_v1 = vpop.f32.mrb[18].mxu0 }
 0x5bc   :  { %v744_v3 = vadd.f32 %v743_v1, %v2742_v59  ;;  %v2278_v4 = vpop.f32.mrb[19].mxu0  ;;  %v747_v5 = vsel %vm383_vm13, %v741_v63, -inf }
 0x5bd   :  { %748 = vmax.xlane.f32.xlu1 %v747_v5 }
 0x5be   :  { %v750_v7 = vsel %vm383_vm13, %v744_v3, -inf }
 0x5bf   :  { %751 = vmax.xlane.f32.xlu0 %v750_v7 }
 0x5c1   :  { %397 = vadd.xlane.f32.xlu1 %v396_v9 }
 0x5c3   :  { %400 = vadd.xlane.f32.xlu0 %v399_v10  ;;  %v2062_v10 = vld [vmem:[%s3083_s10] ss:$0 sm:$0xff] }
 0x642   :  { %v626_v11 = vpop.xlane.xlu0 %625 }
 0x643   :  { %v630_v12 = vsub.f32 %v618_v53, %v626_v11 }
 0x645   :  { %v632_v13 = vmul.f32 1.442695, %v630_v12 }
 0x646   :  { %v629_v14 = vpop.xlane.xlu0 %628 }
 0x647   :  { %2450 = vpow2.f32 %v632_v13  ;;  %v631_v15 = vsub.f32 %v621_v56, %v629_v14 }
 0x649   :  { %v634_v16 = vmul.f32 1.442695, %v631_v15 }
 0x64a   :  { %v749_v17 = vpop.xlane.xlu1 %748 }
 0x64b   :  { %2452 = vpow2.f32 %v634_v16  ;;  %v753_v18 = vsub.f32 %v741_v63, %v749_v17 }
 0x64c   :  { %v752_v19 = vpop.xlane.xlu0 %751 }
 0x64d   :  { %v755_v20 = vmul.f32 1.442695, %v753_v18  ;;  %v754_v21 = vsub.f32 %v744_v3, %v752_v19 }
 0x64e   :  { %v398_v22 = vpop.xlane.xlu1 %397 }
 0x64f   :  { %2454 = vpow2.f32 %v755_v20  ;;  %v757_v23 = vmul.f32 1.442695, %v754_v21 }
 0x650   :  { %2456 = vrcp.f32 %v398_v22  ;;  %v401_v24 = vpop.xlane.xlu0 %400 }
 0x651   :  { %v2451_v25 = vpop.eup %2450  ;;  %2458 = vpow2.f32 %v757_v23 }
 0x652   :  { %2460 = vrcp.f32 %v401_v24  ;;  %v636_v26 = vsel %vm383_vm13, %v2451_v25, 0.0 }
 0x653   :  { %637 = vadd.xlane.f32.xlu1 %v636_v26 }
 0x655   :  { %v2453_v27 = vpop.eup %2452 }
 0x656   :  { %v639_v30 = vsel %vm383_vm13, %v2453_v27, 0.0 }
 0x657   :  { %640 = vadd.xlane.f32.xlu0 %v639_v30 }
 0x659   :  { %v2455_v31 = vpop.eup %2454 }
 0x65a   :  { %v2457_v32 = vpop.eup %2456  ;;  %v759_v33 = vsel %vm383_vm13, %v2455_v31, 0.0 }
 0x65b   :  { %v2459_v34 = vpop.eup %2458  ;;  %760 = vadd.xlane.f32.xlu1 %v759_v33  ;;  %v404_v37 = vmul.f32 %v2457_v32, %v2447_v6  ;;  %v2422_v32 = vld [vmem:[%s3085_s13] sm:$0xff]   ;;  %v2423_v33 = vld [vmem:[%s3085_s13 + $0x8] sm:$0xff]  }
 0x65c   :  { %v2461_v35 = vpop.eup %2460  ;;  %v762_v36 = vsel %vm383_vm13, %v2459_v34, 0.0 }
 0x65d   :  { %v405_v38 = vmul.f32 %v2461_v35, %v2449_v8  ;;  %763 = vadd.xlane.f32.xlu0 %v762_v36 }
 0x65f   :  { %v406_v39 = vpack.c.bf16 %v405_v38, %v404_v37 }
 0x661   :  { %2258 = vmatmul.mubr.msk.bf16.vlgmr.msra.gmra.mrb[12].mxu1 %vm383_vm13, %v406_v39 }
 0x662   :  { %2269 = vmatprep.mubr.msk.bf16.mxu1 %vm2520_vm1, %v2519_v2 }
 0x66c   :  { %647 = vrot.lane.b32.xlu1 %v2727_v50, %s3101_s26 }
 0x673   :  { %770 = vrot.lane.b32.xlu0 %v2727_v50, %s3100_s27 }
 0x6e0   :  { %v638_v40 = vpop.xlane.xlu1 %637 }
 0x6e1   :  { %2462 = vrcp.f32 %v638_v40 }
 0x6e4   :  { %v641_v41 = vpop.xlane.xlu0 %640 }
 0x6e5   :  { %2464 = vrcp.f32 %v641_v41  ;;  %v2063_v41 = vld [vmem:[%s3086_s15] ss:$0 sm:$0xff] }
 0x6e8   :  { %v761_v43 = vpop.xlane.xlu1 %760 }
 0x6e9   :  { %2466 = vrcp.f32 %v761_v43 }
 0x6ea   :  { %v764_v44 = vpop.xlane.xlu0 %763 }
 0x6eb   :  { %2468 = vrcp.f32 %v764_v44  ;;  %v2463_v47 = vpop.eup %2462 }
 0x6ec   :  { %v648_v45 = vpop.permute.xlu1 %647  ;;  %v644_v49 = vmul.f32 %v2463_v47, %v2451_v25 }
 0x6ed   :  { %2268 = vmatpush3.bf16.msra.mxu1 %v648_v45 }
 0x6ee   :  { %2279 = vmatprep.subr.bf16.mxu1 %v2519_v2  ;;  %v771_v54 = vpop.permute.xlu0 %770 }
 0x6ef   :  { %v2465_v48 = vpop.eup %2464 }
 0x6f0   :  { %v645_v51 = vmul.f32 %v2465_v48, %v2453_v27  ;;  %v2064_v48 = vld [vmem:[%s3087_s16] ss:$0 sm:$0xff] }
 0x6f2   :  { %v646_v52 = vpack.c.bf16 %v645_v51, %v644_v49 }
 0x6f3   :  { %v2467_v53 = vpop.eup %2466 }
 0x6f4   :  { %2270 = vmatmul.mubr.msk.bf16.vlgmr.msra.gmra.mrb[16].mxu1 %vm383_vm13, %v646_v52  ;;  %v767_v56 = vmul.f32 %v2467_v53, %v2455_v31  ;;  %v2421_v31 = vld [vmem:[%s3084_s11 + $0x8] sm:$0xff]  }
 0x6f5   :  { %v2469_v50 = vpop.eup %2468  ;;  %2280 = vmatpush3.bf16.msra.mxu1 %v771_v54  ;;  %2281 = vmatprep.mubr.msk.bf16.mxu1 %vm2520_vm1, %v2519_v2  ;;  %v2424_v54 = vld [vmem:[%s3085_s13 + $0x10] sm:$0xff]  }
 0x6f6   :  { %v768_v55 = vmul.f32 %v2469_v50, %v2459_v34  ;;  %2293 = vmatprep.subr.bf16.mxu1 %v2519_v2  ;;  %v2425_v50 = vld [vmem:[%s3085_s13 + $0x18] sm:$0xff]  }
 0x6f8   :  { %v769_v57 = vpack.c.bf16 %v768_v55, %v767_v56  ;;  %v2065_v55 = vld [vmem:[%s3088_s12] ss:$0 sm:$0xff] }
 0x6fc   :  { %2282 = vmatmul.mubr.msk.bf16.vlgmr.msra.gmra.mrb[20].mxu1 %vm383_vm13, %v769_v57 }
 0x6fd   :  { %2301 = vmatprep.mubr.msk.bf16.mxu1 %vm2520_vm1, %v2519_v2  ;;  %2294 = vmatpush3.bf16.msra.mxu1 %v2422_v32  ;;  %v2075_v32 = vld [vmem:[%s3090_s17] ss:$0 sm:$0xff] }
 0x6fe   :  { %2295 = vmatprep.subr.bf16.mxu1 %v2519_v2 }
 0x701   :  { %2296 = vmatpush3.bf16.msra.mxu1 %v2423_v33 }
 0x702   :  { %2297 = vmatprep.subr.bf16.mxu1 %v2519_v2 }
 0x705   :  { %2298 = vmatpush3.bf16.msra.mxu1 %v2424_v54 }
 0x706   :  { %2299 = vmatprep.subr.bf16.mxu1 %v2519_v2 }
 0x709   :  { %2300 = vmatpush3.bf16.msra.mxu1 %v2425_v50  ;;  %v2091_v50 = vld [vmem:[%s3081_s9 + $0x1] ss:$0 sm:$0xff]  ;;  %s3115_s9 = smov 32  }
 0x70a   :  { %2321 = vmatprep.subr.bf16.mxu1 %v2519_v2 }
 0x734   :  { %v566_v60 = vpop.f32.mrb[12].mxu1 }
 0x735   :  { %v567_v61 = vadd.f32 %v566_v60, %v2786_v42  ;;  %v2259_v62 = vpop.f32.mrb[13].mxu1 }
 0x736   :  { %v569_v63 = vpop.f32.mrb[14].mxu1 }
 0x737   :  { %v570_v0 = vadd.f32 %v569_v63, %v2788_v46  ;;  %v2260_v1 = vpop.f32.mrb[15].mxu1 }
 0x7c7   :  { %v687_v3 = vpop.f32.mrb[16].mxu1 }
 0x7c8   :  { %v694_v4 = vadd.f32 %v687_v3, %v567_v61  ;;  %v2271_v5 = vpop.f32.mrb[17].mxu1 }
 0x7c9   :  { %v690_v6 = vpop.f32.mrb[18].mxu1 }
 0x7ca   :  { %v695_v7 = vadd.f32 %v690_v6, %v570_v0  ;;  %v2272_v8 = vpop.f32.mrb[19].mxu1 }
 0x7cf   :  { %v810_v9 = vpop.f32.mrb[20].mxu1 }
 0x7d0   :  { %v817_v11 = vadd.f32 %v810_v9, %v694_v4  ;;  %v2283_v12 = vpop.f32.mrb[21].mxu1  ;;  %v2069_v4 = vld [vmem:[%s3089_s14] ss:$0 sm:$0xff] }
 0x7d1   :  { %v813_v13 = vpop.f32.mrb[22].mxu1 }
 0x7d2   :  { %v826_v42 = vadd.f32 %v2062_v10, %v817_v11  ;;  %v818_v14 = vadd.f32 %v813_v13, %v695_v7  ;;  %v2284_v15 = vpop.f32.mrb[23].mxu1 }
 0x7d4   :  { %v827_v16 = vadd.f32 %v2062_v10, %v818_v14  ;;  %v828_v46 = vadd.f32 %v826_v42, %v2692_v28 }
 0x7d6   :  { %v832_v17 = vsel %vm221_vm6, %v828_v46, 0.0  ;;  %v829_v18 = vadd.f32 %v827_v16, %v2694_v29  ;;  %v2420_v29 = vld [vmem:[%s3084_s11] sm:$0xff]  }
 0x7d7   :  { %833 = vadd.xlane.f32.xlu1 %v832_v17  ;;  %2286 = vmatpush3.bf16.msra.mxu0 %v2420_v29 }
 0x7d8   :  { %v835_v19 = vsel %vm221_vm6, %v829_v18, 0.0  ;;  %2287 = vmatprep.subr.bf16.mxu0 %v2519_v2 }
 0x7d9   :  { %836 = vadd.xlane.f32.xlu0 %v835_v19 }
 0x7db   :  { %2288 = vmatpush3.bf16.msra.mxu0 %v2421_v31 }
 0x7dc   :  { %2305 = vmatprep.subr.bf16.mxu0 %v2519_v2 }
 0x864   :  { %v834_v20 = vpop.xlane.xlu1 %833 }
 0x865   :  { %v839_v21 = vmul.f32 0.03125, %v834_v20 }
 0x866   :  { %v837_v22 = vpop.xlane.xlu0 %836 }
 0x867   :  { %v841_v23 = vsub.f32 %v828_v46, %v839_v21  ;;  %v840_v24 = vmul.f32 0.03125, %v837_v22 }
 0x869   :  { %v842_v25 = vsub.f32 %v829_v18, %v840_v24  ;;  %v843_v26 = vmul.f32 %v841_v23, %v841_v23  ;;  %v2427_v24 = vld [vmem:[%s3112_s0 + $0x18] sm:$0xff]  }
 0x86b   :  { %v845_v27 = vsel %vm221_vm6, %v843_v26, 0.0  ;;  %v844_v30 = vmul.f32 %v842_v25, %v842_v25 }
 0x86c   :  { %846 = vadd.xlane.f32.xlu1 %v845_v27 }
 0x86d   :  { %v848_v28 = vsel %vm221_vm6, %v844_v30, 0.0 }
 0x86e   :  { %849 = vadd.xlane.f32.xlu0 %v848_v28 }
 0x8f9   :  { %v847_v34 = vpop.xlane.xlu1 %846 }
 0x8fa   :  { %v851_v35 = vmul.f32 0.03125, %v847_v34 }
 0x8fb   :  { %v850_v36 = vpop.xlane.xlu0 %849 }
 0x8fc   :  { %v853_v37 = vadd.f32 1e-05, %v851_v35  ;;  %v852_v38 = vmul.f32 0.03125, %v850_v36 }
 0x8fe   :  { %2470 = vrsqrt.f32 %v853_v37  ;;  %v854_v39 = vadd.f32 1e-05, %v852_v38  ;;  %v2076_v37 = vld [vmem:[%s3091_s18] ss:$0 sm:$0xff] }
 0x900   :  { %2472 = vrsqrt.f32 %v854_v39 }
 0x908   :  { %v2471_v40 = vpop.eup %2470 }
 0x909   :  { %v857_v43 = vmul.f32 %v2471_v40, %v841_v23  ;;  %v2426_v23 = vld [vmem:[%s3112_s0 + $0x10] sm:$0xff]  }
 0x90a   :  { %v2473_v44 = vpop.eup %2472 }
 0x90b   :  { %v865_v45 = vmul.f32 %v2063_v41, %v857_v43  ;;  %v858_v47 = vmul.f32 %v2473_v44, %v842_v25  ;;  %v2429_v44 = vld [vmem:[%s3113_s24 + $0x18] sm:$0xff]  }
 0x90d   :  { %v866_v49 = vmul.f32 %v2063_v41, %v858_v47  ;;  %v873_v51 = vadd.f32 %v2064_v48, %v865_v45  ;;  %v2428_v41 = vld [vmem:[%s3113_s24 + $0x10] sm:$0xff]   ;;  %v2082_v45 = vld [vmem:[%s3080_s7 + $0x1] ss:$0 sm:$0xff]  ;;  %s3114_s7 = smov 64  }
 0x90f   :  { %v874_v52 = vadd.f32 %v2064_v48, %v866_v49 }
 0x911   :  { %v875_v53 = vpack.c.bf16 %v874_v52, %v873_v51 }
 0x913   :  { %2290 = vmatmul.mubr.msk.bf16.vlgmr.msra.gmra.mrb[20].mxu0 %vm221_vm6, %v875_v53 }
 0x914   :  { %2309 = vmatprep.mubr.msk.bf16.mxu0 %vm2520_vm1, %v2519_v2  ;;  %2306 = vmatpush3.bf16.msra.mxu0 %v2426_v23 }
 0x915   :  { %2307 = vmatprep.subr.bf16.mxu0 %v2519_v2 }
 0x918   :  { %2308 = vmatpush3.bf16.msra.mxu0 %v2427_v24 }
 0x919   :  { %2313 = vmatprep.subr.bf16.mxu0 %v2519_v2 }
 0x9e6   :  { %v936_v56 = vpop.f32.mrb[20].mxu0 }
 0x9e7   :  { %v937_v57 = vadd.f32 %v2065_v55, %v936_v56  ;;  %v2291_v60 = vpop.f32.mrb[21].mxu0 }
 0x9e8   :  { %v939_v61 = vpop.f32.mrb[22].mxu0 }
 0x9e9   :  { %v940_v62 = vadd.f32 %v2065_v55, %v939_v61  ;;  %v2292_v63 = vpop.f32.mrb[23].mxu0  ;;  %v943_v0 = vmax.f32 %v937_v57, 0.0 }
 0x9eb   :  { %v944_v1 = vmax.f32 %v940_v62, 0.0 }
 0x9ed   :  { %v945_v3 = vpack.c.bf16 %v944_v1, %v943_v0 }
 0x9ef   :  { %2302 = vmatmul.mubr.msk.bf16.vlgmr.msra.gmra.mrb[24].mxu1 %vm985_vm14, %v945_v3 }
 0x9f0   :  { %2323 = vmatprep.mubr.msk.bf16.mxu1 %vm2520_vm1, %v2519_v2 }
 0xac2   :  { %v1023_v5 = vpop.f32.mrb[24].mxu1 }
 0xac3   :  { %v1024_v6 = vadd.f32 %v2069_v4, %v1023_v5  ;;  %v2303_v7 = vpop.f32.mrb[25].mxu1 }
 0xac4   :  { %v1026_v8 = vpop.f32.mrb[26].mxu1 }
 0xac5   :  { %v1027_v9 = vadd.f32 %v2069_v4, %v1026_v8  ;;  %v2304_v10 = vpop.f32.mrb[27].mxu1  ;;  %v1030_v11 = vadd.f32 %v1024_v6, %v873_v51 }
 0xac7   :  { %v1034_v12 = vsel %vm221_vm6, %v1030_v11, 0.0  ;;  %v1031_v13 = vadd.f32 %v1027_v9, %v874_v52 }
 0xac8   :  { %1035 = vadd.xlane.f32.xlu1 %v1034_v12 }
 0xac9   :  { %v1037_v42 = vsel %vm221_vm6, %v1031_v13, 0.0 }
 0xaca   :  { %1038 = vadd.xlane.f32.xlu0 %v1037_v42 }
 0xb55   :  { %v1036_v14 = vpop.xlane.xlu1 %1035 }
 0xb56   :  { %v1040_v15 = vmul.f32 0.03125, %v1036_v14 }
 0xb57   :  { %v1039_v16 = vpop.xlane.xlu0 %1038 }
 0xb58   :  { %v1042_v46 = vsub.f32 %v1030_v11, %v1040_v15  ;;  %v1041_v17 = vmul.f32 0.03125, %v1039_v16 }
 0xb5a   :  { %v1043_v18 = vsub.f32 %v1031_v13, %v1041_v17  ;;  %v1044_v19 = vmul.f32 %v1042_v46, %v1042_v46 }
 0xb5c   :  { %v1046_v20 = vsel %vm221_vm6, %v1044_v19, 0.0  ;;  %v1045_v21 = vmul.f32 %v1043_v18, %v1043_v18 }
 0xb5d   :  { %1047 = vadd.xlane.f32.xlu1 %v1046_v20 }
 0xb5e   :  { %v1049_v22 = vsel %vm221_vm6, %v1045_v21, 0.0 }
 0xb5f   :  { %1050 = vadd.xlane.f32.xlu0 %v1049_v22 }
 0xbea   :  { %v1048_v25 = vpop.xlane.xlu1 %1047 }
 0xbeb   :  { %v1052_v26 = vmul.f32 0.03125, %v1048_v25 }
 0xbec   :  { %v1051_v27 = vpop.xlane.xlu0 %1050 }
 0xbed   :  { %v1054_v30 = vadd.f32 1e-05, %v1052_v26  ;;  %v1053_v28 = vmul.f32 0.03125, %v1051_v27 }
 0xbef   :  { %2474 = vrsqrt.f32 %v1054_v30  ;;  %v1055_v29 = vadd.f32 1e-05, %v1053_v28 }
 0xbf1   :  { %2476 = vrsqrt.f32 %v1055_v29 }
 0xbf9   :  { %v2475_v31 = vpop.eup %2474 }
 0xbfa   :  { %v1058_v33 = vmul.f32 %v2475_v31, %v1042_v46 }
 0xbfb   :  { %v2477_v34 = vpop.eup %2476 }
 0xbfc   :  { %v1066_v35 = vmul.f32 %v2075_v32, %v1058_v33  ;;  %v1059_v36 = vmul.f32 %v2477_v34, %v1043_v18 }
 0xbfe   :  { %v1067_v38 = vmul.f32 %v2075_v32, %v1059_v36  ;;  %v2890_v39 = vadd.f32 %v2076_v37, %v1066_v35 }
 0xc00   :  { %v2892_v40 = vadd.f32 %v2076_v37, %v1067_v38 }
 0xc02   :  { %v1076_v43 = vpack.c.bf16 %v2892_v40, %v2890_v39 }
 0xc04   :  { %2310 = vmatmul.mubr.msk.bf16.vlgmr.msra.gmra.mrb[24].mxu0 %vm221_vm6, %v1076_v43 }
 0xc05   :  { %2314 = vmatpush3.bf16.msra.mxu0 %v2428_v41  ;;  %2317 = vmatprep.mubr.msk.bf16.mxu0 %vm2520_vm1, %v2519_v2 }
 0xc06   :  { %2315 = vmatprep.subr.bf16.mxu0 %v2519_v2 }
 0xc09   :  { %2316 = vmatpush3.bf16.msra.mxu0 %v2429_v44 }
 0xc0a   :  { %2327 = vmatprep.subr.bf16.mxu0 %v2519_v2 }
 0xc0c   :  { %2318 = vmatmul.mubr.msk.bf16.vlgmr.msra.gmra.mrb[28].mxu0 %vm221_vm6, %v1076_v43 }
 0xc0d   :  { %2329 = vmatprep.mubr.msk.bf16.mxu0 %vm2520_vm1, %v2519_v2 }
 0xcd7   :  { %v1139_v47 = vpop.f32.mrb[24].mxu0 }
 0xcd8   :  { %v2311_v48 = vpop.f32.mrb[25].mxu0  ;;  %v1140_v51 = vadd.f32 %v2082_v45, %v1139_v47 }
 0xcd9   :  { %v1142_v49 = vpop.f32.mrb[26].mxu0 }
 0xcda   :  { %v1143_v52 = vadd.f32 %v2082_v45, %v1142_v49  ;;  %v2312_v53 = vpop.f32.mrb[27].mxu0 }
 0xcdc   :  { %v1212_v54 = vpack.c.bf16 %v1143_v52, %v1140_v51 }
 0xcde   :  { %1287 = vrot.lane.b32.xlu0 %v1212_v54, %s2522_s6  ;;  %1289 = vrot.lane.b32.xlu1 %v1212_v54, %s2521_s1 }
 0xcdf   :  { %v1205_v55 = vpop.f32.mrb[28].mxu0 }
 0xce0   :  { %v2319_v56 = vpop.f32.mrb[29].mxu0  ;;  %v1206_v60 = vadd.f32 %v2091_v50, %v1205_v55 }
 0xce1   :  { %v1208_v57 = vpop.f32.mrb[30].mxu0 }
 0xce2   :  { %v1209_v61 = vadd.f32 %v2091_v50, %v1208_v57  ;;  %v2320_v62 = vpop.f32.mrb[31].mxu0 }
 0xce4   :  { %v2918_v63 = vpack.c.bf16 %v1209_v61, %v1206_v60 }
 0xd50   :  { %v1290_v0 = vpop.permute.xlu1 %1289  ;;  %v1288_v3 = vpop.permute.xlu0 %1287 }
 0xd51   :  { %v1295_v1 = vsel %vm335_vm7, %v1290_v0, 0 }
 0xd52   :  { %2328 = vmatpush3.bf16.xpose.msra.mxu0 %v1295_v1 }
 0xd53   :  { %2339 = vmatprep.subr.bf16.mxu0 %v2519_v2 }
 0xd59   :  { %2330 = vmatmul.mubr.msk.bf16.vlgmr.msra.gmra.mrb[32].mxu0 %vm335_vm7, %v1288_v3 }
 0xd5a   :  { %2340 = vmatpush3.bf16.msra.mxu0 %v2918_v63  ;;  %2341 = vmatprep.mubr.msk.bf16.mxu0 %vm2520_vm1, %v2519_v2 }
 0xd5b   :  { %2351 = vmatprep.subr.bf16.mxu0 %v2519_v2 }
 0xe2c   :  { %v1331_v4 = vpop.f32.mrb[32].mxu0 }
 0xe2d   :  { %v1332_v5 = vadd.f32 %v1331_v4, %v2740_v58  ;;  %v2331_v6 = vpop.f32.mrb[33].mxu0 }
 0xe2e   :  { %v1334_v7 = vpop.f32.mrb[34].mxu0 }
 0xe2f   :  { %v1335_v8 = vadd.f32 %v1334_v7, %v2742_v59  ;;  %v2332_v9 = vpop.f32.mrb[35].mxu0  ;;  %v1338_v10 = vsel %vm383_vm13, %v1332_v5, -inf }
 0xe30   :  { %1339 = vmax.xlane.f32.xlu1 %v1338_v10 }
 0xe31   :  { %v1341_v11 = vsel %vm383_vm13, %v1335_v8, -inf }
 0xe32   :  { %1342 = vmax.xlane.f32.xlu0 %v1341_v11 }
 0xe41   :  { %1215 = vrot.lane.b32.xlu1 %v1212_v54, %s2524_s3 }
 0xebd   :  { %v1340_v12 = vpop.xlane.xlu1 %1339 }
 0xebe   :  { %v1344_v13 = vsub.f32 %v1332_v5, %v1340_v12 }
 0xebf   :  { %v1343_v42 = vpop.xlane.xlu0 %1342 }
 0xec0   :  { %v1346_v14 = vmul.f32 1.442695, %v1344_v13  ;;  %v1345_v15 = vsub.f32 %v1335_v8, %v1343_v42 }
 0xec1   :  { %v1216_v16 = vpop.permute.xlu1 %1215 }
 0xec2   :  { %2478 = vpow2.f32 %v1346_v14  ;;  %v1348_v46 = vmul.f32 1.442695, %v1345_v15  ;;  %v1221_v17 = vsel %vm335_vm7, %v1216_v16, 0 }
 0xec3   :  { %2322 = vmatpush3.bf16.xpose.msra.mxu1 %v1221_v17 }
 0xec4   :  { %2480 = vpow2.f32 %v1348_v46  ;;  %2333 = vmatprep.subr.bf16.mxu1 %v2519_v2 }
 0xeca   :  { %2324 = vmatmul.mubr.msk.bf16.vlgmr.msra.gmra.mrb[28].mxu1 %vm335_vm7, %v1212_v54 }
 0xecb   :  { %2335 = vmatprep.mubr.msk.bf16.mxu1 %vm2520_vm1, %v2519_v2 }
 0xecc   :  { %v2479_v18 = vpop.eup %2478 }
 0xecd   :  { %v1350_v19 = vsel %vm383_vm13, %v2479_v18, 0.0 }
 0xece   :  { %v2481_v20 = vpop.eup %2480  ;;  %1351 = vadd.xlane.f32.xlu1 %v1350_v19 }
 0xecf   :  { %v1353_v21 = vsel %vm383_vm13, %v2481_v20, 0.0 }
 0xed0   :  { %1354 = vadd.xlane.f32.xlu0 %v1353_v21 }
 0xedf   :  { %1455 = vrot.lane.b32.xlu1 %v1212_v54, %s2525_s23 }
 0xee3   :  { %1453 = vrot.lane.b32.xlu1 %v1212_v54, %s2526_s4 }
 0xee6   :  { %1362 = vrot.lane.b32.xlu0 %v2918_v63, %s2524_s3 }
 0xee7   :  { %1576 = vrot.lane.b32.xlu1 %v1212_v54, %s2527_s5 }
 0xeea   :  { %1578 = vrot.lane.b32.xlu0 %v1212_v54, %s2528_s25 }
 0xf5b   :  { %v1352_v22 = vpop.xlane.xlu1 %1351 }
 0xf5c   :  { %2482 = vrcp.f32 %v1352_v22 }
 0xf5d   :  { %v1355_v23 = vpop.xlane.xlu0 %1354 }
 0xf5e   :  { %2484 = vrcp.f32 %v1355_v23 }
 0xf5f   :  { %v1456_v28 = vpop.permute.xlu1 %1455 }
 0xf60   :  { %v1461_v31 = vsel %vm335_vm7, %v1456_v28, 0 }
 0xf61   :  { %v1363_v24 = vpop.permute.xlu0 %1362 }
 0xf62   :  { %2334 = vmatpush3.bf16.msra.mxu1 %v1363_v24 }
 0xf63   :  { %2345 = vmatprep.subr.bf16.mxu1 %v2519_v2  ;;  %v1454_v33 = vpop.permute.xlu1 %1453 }
 0xf65   :  { %v1579_v32 = vpop.permute.xlu0 %1578 }
 0xf66   :  { %v2483_v25 = vpop.eup %2482  ;;  %v1584_v34 = vsel %vm335_vm7, %v1579_v32, 0 }
 0xf67   :  { %v1358_v27 = vmul.f32 %v2483_v25, %v2479_v18  ;;  %v1577_v35 = vpop.permute.xlu1 %1576 }
 0xf68   :  { %v2485_v26 = vpop.eup %2484 }
 0xf69   :  { %v1359_v30 = vmul.f32 %v2485_v26, %v2481_v20 }
 0xf6b   :  { %v1360_v29 = vpack.c.bf16 %v1359_v30, %v1358_v27 }
 0xf6d   :  { %2336 = vmatmul.mubr.msk.bf16.vlgmr.msra.gmra.mrb[32].mxu1 %vm383_vm13, %v1360_v29 }
 0xf6e   :  { %2346 = vmatpush3.bf16.xpose.msra.mxu1 %v1461_v31  ;;  %2347 = vmatprep.mubr.msk.bf16.mxu1 %vm2520_vm1, %v2519_v2 }
 0xf6f   :  { %2357 = vmatprep.subr.bf16.mxu1 %v2519_v2 }
 0xf75   :  { %2348 = vmatmul.mubr.msk.bf16.vlgmr.msra.gmra.mrb[36].mxu1 %vm335_vm7, %v1454_v33 }
 0xf76   :  { %2358 = vmatpush3.bf16.xpose.msra.mxu1 %v1584_v34  ;;  %2359 = vmatprep.mubr.msk.bf16.mxu1 %vm2520_vm1, %v2519_v2 }
 0xf77   :  { %2369 = vmatprep.subr.bf16.mxu1 %v2519_v2 }
 0xf7d   :  { %2360 = vmatmul.mubr.msk.bf16.vlgmr.msra.gmra.mrb[40].mxu1 %vm335_vm7, %v1577_v35 }
 0xf7e   :  { %2373 = vmatprep.mubr.msk.bf16.mxu1 %vm2520_vm1, %v2519_v2 }
 0xf9d   :  { %v1257_v36 = vpop.f32.mrb[28].mxu1 }
 0xf9e   :  { %v1258_v37 = vadd.f32 %v1257_v36, %v2740_v58  ;;  %v2325_v38 = vpop.f32.mrb[29].mxu1 }
 0xf9f   :  { %v1260_v41 = vpop.f32.mrb[30].mxu1 }
 0xfa0   :  { %v1261_v43 = vadd.f32 %v1260_v41, %v2742_v59  ;;  %v2326_v44 = vpop.f32.mrb[31].mxu1  ;;  %v1264_v45 = vsel %vm383_vm13, %v1258_v37, -inf }
 0xfa1   :  { %1265 = vmax.xlane.f32.xlu0 %v1264_v45 }
 0xfa2   :  { %v1267_v47 = vsel %vm383_vm13, %v1261_v43, -inf }
 0xfa3   :  { %1268 = vmax.xlane.f32.xlu1 %v1267_v47 }
0x102e   :  { %v1266_v48 = vpop.xlane.xlu0 %1265 }
0x102f   :  { %v1270_v53 = vsub.f32 %v1258_v37, %v1266_v48 }
0x1030   :  { %v1269_v51 = vpop.xlane.xlu1 %1268 }
0x1031   :  { %v1271_v55 = vsub.f32 %v1261_v43, %v1269_v51  ;;  %v1272_v56 = vmul.f32 1.442695, %v1270_v53 }
0x1033   :  { %v1274_v57 = vmul.f32 1.442695, %v1271_v55  ;;  %2486 = vpow2.f32 %v1272_v56 }
0x1035   :  { %2488 = vpow2.f32 %v1274_v57 }
0x103d   :  { %v2487_v13 = vpop.eup %2486 }
0x103e   :  { %v1276_v15 = vsel %vm383_vm13, %v2487_v13, 0.0 }
0x103f   :  { %v2489_v14 = vpop.eup %2488 }
0x1040   :  { %v2963_v49 = vpop.f32.mrb[32].mxu1  ;;  %v1279_v16 = vsel %vm383_vm13, %v2489_v14, 0.0 }
0x1041   :  { %v2337_v52 = vpop.f32.mrb[33].mxu1 }
0x1042   :  { %v2965_v54 = vpop.f32.mrb[34].mxu1 }
0x1043   :  { %v2338_v50 = vpop.f32.mrb[35].mxu1 }
0x1048   :  { %v1497_v60 = vpop.f32.mrb[36].mxu1 }
0x1049   :  { %v1498_v61 = vadd.f32 %v1497_v60, %v2740_v58  ;;  %v2349_v62 = vpop.f32.mrb[37].mxu1 }
0x104a   :  { %v1500_v0 = vpop.f32.mrb[38].mxu1 }
0x104b   :  { %v1501_v1 = vadd.f32 %v1500_v0, %v2742_v59  ;;  %v2350_v3 = vpop.f32.mrb[39].mxu1  ;;  %v1504_v4 = vsel %vm383_vm13, %v1498_v61, -inf }
0x104c   :  { %1505 = vmax.xlane.f32.xlu0 %v1504_v4 }
0x104d   :  { %v1507_v5 = vsel %vm383_vm13, %v1501_v1, -inf }
0x1050   :  { %1508 = vmax.xlane.f32.xlu0 %v1507_v5  ;;  %v1620_v6 = vpop.f32.mrb[40].mxu1 }
0x1051   :  { %v1621_v7 = vadd.f32 %v1620_v6, %v2740_v58  ;;  %v2361_v8 = vpop.f32.mrb[41].mxu1 }
0x1052   :  { %v1623_v9 = vpop.f32.mrb[42].mxu1 }
0x1053   :  { %v1624_v10 = vadd.f32 %v1623_v9, %v2742_v59  ;;  %v2362_v11 = vpop.f32.mrb[43].mxu1  ;;  %v1627_v12 = vsel %vm383_vm13, %v1621_v7, -inf }
0x1054   :  { %1628 = vmax.xlane.f32.xlu1 %v1627_v12 }
0x1055   :  { %v1630_v42 = vsel %vm383_vm13, %v1624_v10, -inf }
0x1056   :  { %1631 = vmax.xlane.f32.xlu0 %v1630_v42 }
0x1058   :  { %1277 = vadd.xlane.f32.xlu1 %v1276_v15 }
0x105a   :  { %1280 = vadd.xlane.f32.xlu0 %v1279_v16 }
0x10d9   :  { %v1506_v58 = vpop.xlane.xlu0 %1505 }
0x10da   :  { %v1510_v46 = vsub.f32 %v1498_v61, %v1506_v58 }
0x10dc   :  { %v1512_v17 = vmul.f32 1.442695, %v1510_v46 }
0x10dd   :  { %v1509_v18 = vpop.xlane.xlu0 %1508 }
0x10de   :  { %2490 = vpow2.f32 %v1512_v17  ;;  %v1511_v59 = vsub.f32 %v1501_v1, %v1509_v18 }
0x10e0   :  { %v1514_v19 = vmul.f32 1.442695, %v1511_v59 }
0x10e1   :  { %v1629_v20 = vpop.xlane.xlu1 %1628 }
0x10e2   :  { %2492 = vpow2.f32 %v1514_v19  ;;  %v1633_v21 = vsub.f32 %v1621_v7, %v1629_v20 }
0x10e3   :  { %v1632_v22 = vpop.xlane.xlu0 %1631 }
0x10e4   :  { %v1635_v23 = vmul.f32 1.442695, %v1633_v21  ;;  %v1634_v24 = vsub.f32 %v1624_v10, %v1632_v22 }
0x10e5   :  { %v1278_v25 = vpop.xlane.xlu1 %1277 }
0x10e6   :  { %2494 = vpow2.f32 %v1635_v23  ;;  %v1637_v26 = vmul.f32 1.442695, %v1634_v24 }
0x10e7   :  { %2496 = vrcp.f32 %v1278_v25  ;;  %v1281_v27 = vpop.xlane.xlu0 %1280 }
0x10e8   :  { %v2491_v30 = vpop.eup %2490  ;;  %2498 = vpow2.f32 %v1637_v26 }
0x10e9   :  { %2500 = vrcp.f32 %v1281_v27  ;;  %v1516_v28 = vsel %vm383_vm13, %v2491_v30, 0.0 }
0x10ea   :  { %1517 = vadd.xlane.f32.xlu1 %v1516_v28 }
0x10ec   :  { %v2493_v29 = vpop.eup %2492 }
0x10ed   :  { %v1519_v31 = vsel %vm383_vm13, %v2493_v29, 0.0 }
0x10ee   :  { %1520 = vadd.xlane.f32.xlu0 %v1519_v31  ;;  %v2432_v31 = vld [vmem:[%s3085_s13 + $0x20] sm:$0xff]  }
0x10f0   :  { %v2495_v32 = vpop.eup %2494 }
0x10f1   :  { %v2497_v33 = vpop.eup %2496  ;;  %v1639_v34 = vsel %vm383_vm13, %v2495_v32, 0.0 }
0x10f2   :  { %v2499_v35 = vpop.eup %2498  ;;  %1640 = vadd.xlane.f32.xlu1 %v1639_v34  ;;  %v1284_v38 = vmul.f32 %v2497_v33, %v2487_v13 }
0x10f3   :  { %v2501_v36 = vpop.eup %2500  ;;  %v1642_v37 = vsel %vm383_vm13, %v2499_v35, 0.0 }
0x10f4   :  { %v1285_v41 = vmul.f32 %v2501_v36, %v2489_v14  ;;  %1643 = vadd.xlane.f32.xlu0 %v1642_v37  ;;  %v2104_v14 = vld [vmem:[%s3083_s10 + $0x1] ss:$0 sm:$0xff] }
0x10f6   :  { %v1286_v43 = vpack.c.bf16 %v1285_v41, %v1284_v38 }
0x10f8   :  { %2342 = vmatmul.mubr.msk.bf16.vlgmr.msra.gmra.mrb[36].mxu0 %vm383_vm13, %v1286_v43  ;;  %v2107_v43 = vld [vmem:[%s3086_s15 + $0x1] ss:$0 sm:$0xff] }
0x10f9   :  { %2353 = vmatprep.mubr.msk.bf16.mxu0 %vm2520_vm1, %v2519_v2 }
0x1103   :  { %1527 = vrot.lane.b32.xlu1 %v2918_v63, %s3114_s7 }
0x110a   :  { %1650 = vrot.lane.b32.xlu0 %v2918_v63, %s3115_s9 }
0x1177   :  { %v1518_v44 = vpop.xlane.xlu1 %1517 }
0x1178   :  { %2502 = vrcp.f32 %v1518_v44 }
0x117b   :  { %v1521_v45 = vpop.xlane.xlu0 %1520 }
0x117c   :  { %2504 = vrcp.f32 %v1521_v45 }
0x117f   :  { %v1641_v47 = vpop.xlane.xlu1 %1640 }
0x1180   :  { %2506 = vrcp.f32 %v1641_v47 }
0x1181   :  { %v1644_v48 = vpop.xlane.xlu0 %1643 }
0x1182   :  { %2508 = vrcp.f32 %v1644_v48  ;;  %v2503_v52 = vpop.eup %2502 }
0x1183   :  { %v1528_v51 = vpop.permute.xlu1 %1527  ;;  %v1524_v50 = vmul.f32 %v2503_v52, %v2491_v30 }
0x1184   :  { %2352 = vmatpush3.bf16.msra.mxu0 %v1528_v51  ;;  %v2108_v51 = vld [vmem:[%s3087_s16 + $0x1] ss:$0 sm:$0xff] }
0x1185   :  { %2363 = vmatprep.subr.bf16.mxu0 %v2519_v2  ;;  %v1651_v60 = vpop.permute.xlu0 %1650 }
0x1186   :  { %v2505_v53 = vpop.eup %2504 }
0x1187   :  { %v1525_v55 = vmul.f32 %v2505_v53, %v2493_v29  ;;  %v2431_v29 = vld [vmem:[%s3084_s11 + $0x18] sm:$0xff]  }
0x1189   :  { %v1526_v56 = vpack.c.bf16 %v1525_v55, %v1524_v50 }
0x118a   :  { %v2507_v57 = vpop.eup %2506 }
0x118b   :  { %2354 = vmatmul.mubr.msk.bf16.vlgmr.msra.gmra.mrb[40].mxu0 %vm383_vm13, %v1526_v56  ;;  %v1647_v62 = vmul.f32 %v2507_v57, %v2495_v32  ;;  %v2433_v32 = vld [vmem:[%s3085_s13 + $0x28] sm:$0xff]   ;;  %v2434_v56 = vld [vmem:[%s3085_s13 + $0x30] sm:$0xff]   ;;  %v2435_v57 = vld [vmem:[%s3085_s13 + $0x38] sm:$0xff]  }
0x118c   :  { %v2509_v63 = vpop.eup %2508  ;;  %2364 = vmatpush3.bf16.msra.mxu0 %v1651_v60  ;;  %2365 = vmatprep.mubr.msk.bf16.mxu0 %vm2520_vm1, %v2519_v2  ;;  %v2114_v60 = vld [vmem:[%s3088_s12 + $0x1] ss:$0 sm:$0xff] }
0x118d   :  { %v1648_v61 = vmul.f32 %v2509_v63, %v2499_v35  ;;  %2377 = vmatprep.subr.bf16.mxu0 %v2519_v2 }
0x118f   :  { %v1649_v0 = vpack.c.bf16 %v1648_v61, %v1647_v62 }
0x1193   :  { %2366 = vmatmul.mubr.msk.bf16.vlgmr.msra.gmra.mrb[44].mxu0 %vm383_vm13, %v1649_v0 }
0x1194   :  { %2385 = vmatprep.mubr.msk.bf16.mxu0 %vm2520_vm1, %v2519_v2  ;;  %2378 = vmatpush3.bf16.msra.mxu0 %v2432_v31 }
0x1195   :  { %2379 = vmatprep.subr.bf16.mxu0 %v2519_v2 }
0x1198   :  { %2380 = vmatpush3.bf16.msra.mxu0 %v2433_v32 }
0x1199   :  { %2381 = vmatprep.subr.bf16.mxu0 %v2519_v2 }
0x119c   :  { %2382 = vmatpush3.bf16.msra.mxu0 %v2434_v56 }
0x119d   :  { %2383 = vmatprep.subr.bf16.mxu0 %v2519_v2 }
0x11a0   :  { %2384 = vmatpush3.bf16.msra.mxu0 %v2435_v57 }
0x11cb   :  { %v1446_v1 = vpop.f32.mrb[36].mxu0 }
0x11cc   :  { %v1447_v3 = vadd.f32 %v1446_v1, %v2963_v49  ;;  %v2343_v4 = vpop.f32.mrb[37].mxu0 }
0x11cd   :  { %v1449_v5 = vpop.f32.mrb[38].mxu0 }
0x11ce   :  { %v1450_v6 = vadd.f32 %v1449_v5, %v2965_v54  ;;  %v2344_v7 = vpop.f32.mrb[39].mxu0 }
0x11cf   :  { %v2127_v7 = vld [vmem:[%s3089_s14 + $0x1] ss:$0 sm:$0xff] }
0x125e   :  { %v1567_v8 = vpop.f32.mrb[40].mxu0 }
0x125f   :  { %v1574_v9 = vadd.f32 %v1567_v8, %v1447_v3  ;;  %v2355_v10 = vpop.f32.mrb[41].mxu0 }
0x1260   :  { %v1570_v11 = vpop.f32.mrb[42].mxu0 }
0x1261   :  { %v1575_v12 = vadd.f32 %v1570_v11, %v1450_v6  ;;  %v2356_v13 = vpop.f32.mrb[43].mxu0 }
0x1266   :  { %v1690_v42 = vpop.f32.mrb[44].mxu0 }
0x1267   :  { %v1697_v15 = vadd.f32 %v1690_v42, %v1574_v9  ;;  %v2367_v16 = vpop.f32.mrb[45].mxu0 }
0x1268   :  { %v1693_v58 = vpop.f32.mrb[46].mxu0 }
0x1269   :  { %v1707_v49 = vadd.f32 %v2104_v14, %v1697_v15  ;;  %v1698_v46 = vadd.f32 %v1693_v58, %v1575_v12  ;;  %v2368_v17 = vpop.f32.mrb[47].mxu0 }
0x126b   :  { %v1708_v18 = vadd.f32 %v2104_v14, %v1698_v46  ;;  %v1709_v54 = vadd.f32 %v1707_v49, %v2890_v39 }
0x126d   :  { %v1715_v59 = vsel %vm221_vm6, %v1709_v54, 0.0  ;;  %v1710_v19 = vadd.f32 %v1708_v18, %v2892_v40  ;;  %v2430_v40 = vld [vmem:[%s3084_s11 + $0x10] sm:$0xff]  }
0x126e   :  { %1716 = vadd.xlane.f32.xlu1 %v1715_v59  ;;  %2370 = vmatpush3.bf16.msra.mxu1 %v2430_v40  ;;  %v2135_v40 = vld [vmem:[%s3090_s17 + $0x1] ss:$0 sm:$0xff] }
0x126f   :  { %v1718_v20 = vsel %vm221_vm6, %v1710_v19, 0.0  ;;  %2371 = vmatprep.subr.bf16.mxu1 %v2519_v2 }
0x1270   :  { %1719 = vadd.xlane.f32.xlu0 %v1718_v20 }
0x1272   :  { %2372 = vmatpush3.bf16.msra.mxu1 %v2431_v29 }
0x1273   :  { %2389 = vmatprep.subr.bf16.mxu1 %v2519_v2 }
0x12fb   :  { %v1717_v21 = vpop.xlane.xlu1 %1716 }
0x12fc   :  { %v1721_v22 = vmul.f32 0.03125, %v1717_v21 }
0x12fd   :  { %v1720_v23 = vpop.xlane.xlu0 %1719 }
0x12fe   :  { %v1723_v24 = vsub.f32 %v1709_v54, %v1721_v22  ;;  %v1722_v25 = vmul.f32 0.03125, %v1720_v23  ;;  %v2436_v22 = vld [vmem:[%s3092_s19] sm:$0xff]   ;;  %v2437_v23 = vld [vmem:[%s3092_s19 + $0x8] sm:$0xff]  }
0x1300   :  { %v1724_v26 = vsub.f32 %v1710_v19, %v1722_v25  ;;  %v1725_v27 = vmul.f32 %v1723_v24, %v1723_v24 }
0x1302   :  { %v1727_v30 = vsel %vm221_vm6, %v1725_v27, 0.0  ;;  %v1726_v28 = vmul.f32 %v1724_v26, %v1724_v26 }
0x1303   :  { %1728 = vadd.xlane.f32.xlu1 %v1727_v30 }
0x1304   :  { %v1730_v39 = vsel %vm221_vm6, %v1726_v28, 0.0 }
0x1305   :  { %1731 = vadd.xlane.f32.xlu0 %v1730_v39 }
0x1390   :  { %v1729_v33 = vpop.xlane.xlu1 %1728 }
0x1391   :  { %v1733_v34 = vmul.f32 0.03125, %v1729_v33 }
0x1392   :  { %v1732_v35 = vpop.xlane.xlu0 %1731 }
0x1393   :  { %v1735_v36 = vadd.f32 1e-05, %v1733_v34  ;;  %v1734_v37 = vmul.f32 0.03125, %v1732_v35 }
0x1395   :  { %2510 = vrsqrt.f32 %v1735_v36  ;;  %v1736_v38 = vadd.f32 1e-05, %v1734_v37 }
0x1397   :  { %2512 = vrsqrt.f32 %v1736_v38  ;;  %v2137_v38 = vld [vmem:[%s3093_s20] ss:$0 sm:$0xff] }
0x139f   :  { %v2511_v41 = vpop.eup %2510 }
0x13a0   :  { %v1739_v44 = vmul.f32 %v2511_v41, %v1723_v24 }
0x13a1   :  { %v2513_v45 = vpop.eup %2512 }
0x13a2   :  { %v1747_v47 = vmul.f32 %v2107_v43, %v1739_v44  ;;  %v1740_v48 = vmul.f32 %v2513_v45, %v1724_v26 }
0x13a4   :  { %v1748_v52 = vmul.f32 %v2107_v43, %v1740_v48  ;;  %v1755_v53 = vadd.f32 %v2108_v51, %v1747_v47 }
0x13a6   :  { %v1756_v50 = vadd.f32 %v2108_v51, %v1748_v52 }
0x13a8   :  { %v1757_v55 = vpack.c.bf16 %v1756_v50, %v1755_v53 }
0x13aa   :  { %2374 = vmatmul.mubr.msk.bf16.vlgmr.msra.gmra.mrb[44].mxu1 %vm221_vm6, %v1757_v55 }
0x13ab   :  { %2393 = vmatprep.mubr.msk.bf16.mxu1 %vm2520_vm1, %v2519_v2  ;;  %2390 = vmatpush3.bf16.msra.mxu1 %v2436_v22 }
0x13ac   :  { %2391 = vmatprep.subr.bf16.mxu1 %v2519_v2  ;;  %v2136_v2 = vld [vmem:[%s3091_s18 + $0x1] ss:$0 sm:$0xff] }
0x13af   :  { %2392 = vmatpush3.bf16.msra.mxu1 %v2437_v23 }
0x147d   :  { %v1820_v63 = vpop.f32.mrb[44].mxu1 }
0x147e   :  { %v1821_v61 = vadd.f32 %v2114_v60, %v1820_v63  ;;  %v2375_v62 = vpop.f32.mrb[45].mxu1 }
0x147f   :  { %v1823_v0 = vpop.f32.mrb[46].mxu1 }
0x1480   :  { %v1824_v1 = vadd.f32 %v2114_v60, %v1823_v0  ;;  %v2376_v3 = vpop.f32.mrb[47].mxu1  ;;  %v1827_v4 = vmax.f32 %v1821_v61, 0.0 }
0x1482   :  { %v1828_v5 = vmax.f32 %v1824_v1, 0.0 }
0x1484   :  { %v1829_v6 = vpack.c.bf16 %v1828_v5, %v1827_v4 }
0x1486   :  { %2386 = vmatmul.mubr.msk.bf16.vlgmr.msra.gmra.mrb[48].mxu0 %vm985_vm14, %v1829_v6 }
0x1559   :  { %v1908_v8 = vpop.f32.mrb[48].mxu0 }
0x155a   :  { %v1909_v9 = vadd.f32 %v2127_v7, %v1908_v8  ;;  %v2387_v10 = vpop.f32.mrb[49].mxu0 }
0x155b   :  { %v1911_v11 = vpop.f32.mrb[50].mxu0 }
0x155c   :  { %v1912_v12 = vadd.f32 %v2127_v7, %v1911_v11  ;;  %v2388_v13 = vpop.f32.mrb[51].mxu0  ;;  %v1915_v42 = vadd.f32 %v1909_v9, %v1755_v53 }
0x155e   :  { %v1921_v14 = vsel %vm221_vm6, %v1915_v42, 0.0  ;;  %v1916_v15 = vadd.f32 %v1912_v12, %v1756_v50 }
0x155f   :  { %1922 = vadd.xlane.f32.xlu1 %v1921_v14 }
0x1560   :  { %v1924_v16 = vsel %vm221_vm6, %v1916_v15, 0.0 }
0x1561   :  { %1925 = vadd.xlane.f32.xlu0 %v1924_v16 }
0x15ec   :  { %v1923_v58 = vpop.xlane.xlu1 %1922 }
0x15ed   :  { %v1927_v49 = vmul.f32 0.03125, %v1923_v58 }
0x15ee   :  { %v1926_v46 = vpop.xlane.xlu0 %1925 }
0x15ef   :  { %v1929_v17 = vsub.f32 %v1915_v42, %v1927_v49  ;;  %v1928_v18 = vmul.f32 0.03125, %v1926_v46 }
0x15f1   :  { %v1930_v54 = vsub.f32 %v1916_v15, %v1928_v18  ;;  %v1931_v59 = vmul.f32 %v1929_v17, %v1929_v17 }
0x15f3   :  { %v1933_v19 = vsel %vm221_vm6, %v1931_v59, 0.0  ;;  %v1932_v20 = vmul.f32 %v1930_v54, %v1930_v54 }
0x15f4   :  { %1934 = vadd.xlane.f32.xlu1 %v1933_v19 }
0x15f5   :  { %v1936_v21 = vsel %vm221_vm6, %v1932_v20, 0.0 }
0x15f6   :  { %1937 = vadd.xlane.f32.xlu0 %v1936_v21 }
0x1681   :  { %v1935_v24 = vpop.xlane.xlu1 %1934 }
0x1682   :  { %v1939_v25 = vmul.f32 0.03125, %v1935_v24 }
0x1683   :  { %v1938_v26 = vpop.xlane.xlu0 %1937 }
0x1684   :  { %v1941_v27 = vadd.f32 1e-05, %v1939_v25  ;;  %v1940_v30 = vmul.f32 0.03125, %v1938_v26 }
0x1686   :  { %2514 = vrsqrt.f32 %v1941_v27  ;;  %v1942_v28 = vadd.f32 1e-05, %v1940_v30 }
0x1688   :  { %2516 = vrsqrt.f32 %v1942_v28 }
0x1690   :  { %v2515_v39 = vpop.eup %2514 }
0x1691   :  { %v1945_v29 = vmul.f32 %v2515_v39, %v1929_v17 }
0x1692   :  { %v2517_v31 = vpop.eup %2516 }
0x1693   :  { %v1953_v32 = vmul.f32 %v2135_v40, %v1945_v29  ;;  %v1946_v33 = vmul.f32 %v2517_v31, %v1930_v54 }
0x1695   :  { %v1954_v34 = vmul.f32 %v2135_v40, %v1946_v33  ;;  %v1961_v35 = vadd.f32 %v2136_v2, %v1953_v32 }
0x1697   :  { %v1962_v36 = vadd.f32 %v2136_v2, %v1954_v34 }
0x1699   :  { %v1963_v37 = vpack.c.bf16 %v1962_v36, %v1961_v35 }
0x169b   :  { %2394 = vmatmul.mubr.msk.bf16.vlgmr.msra.gmra.mrb[48].mxu1 %vm221_vm6, %v1963_v37 }
0x176e   :  { %v2024_v41 = vpop.f32.mrb[48].mxu1 }
0x176f   :  { %v2025_v43 = vadd.f32 %v2137_v38, %v2024_v41  ;;  %v2395_v44 = vpop.f32.mrb[49].mxu1 }
0x1770   :  { %v2027_v45 = vpop.f32.mrb[50].mxu1 }
0x1771   :  { %2031 = vst [vmem:[%s3094_s21] sm:$0xff] %v2025_v43  ;;  %v2028_v47 = vadd.f32 %v2137_v38, %v2027_v45  ;;  %v2396_v48 = vpop.f32.mrb[51].mxu1 }
0x1773   :  { %2032 = vst [vmem:[%s3094_s21 + $0x8] sm:$0xff] %v2028_v47 }

</bundles_post_ra>
